<compile_context>
chip_gen: v7x
topology: tpu7x:2x2x1
jax: 0.10.0
libtpu: 0.0.40
codegen_flags: <defaults>
</compile_context>

<pallas_src>
import math
import jax
import jax.numpy as jnp
from jax.experimental import pallas as pl
from jax.experimental.pallas import tpu as pltpu

EPSILON = 1e-8
CHANNELS = 3
K = 3                       # conv1 / conv2 kernel size (module hard-codes 3)
IO_DTYPE = jnp.bfloat16     # HBM-facing activation dtype (in-kernel math is f32)


def _round_up(x, m):
    return (x + m - 1) // m * m


def _nbytes(shape, dtype):
    return int(math.prod(shape)) * jnp.dtype(dtype).itemsize


# ---------------------------------------------------------------------------
# Fused GeneratorBlock kernel (one grid step per batch element)
# ---------------------------------------------------------------------------
def _make_generator_block_kernel(H, W, cin, filters, off0_al, Lp):
    pad = (K - 1) // 2                    # torch _get_same_padding, stride=1
    HW = H * W
    F = filters

    def build_patches(src_f32, c, xpf_ref, pat_ref, mask_ref):
        # src_f32: (c, HW) f32 modulated activation, row-major flat (i*W + j).
        # Zero ONLY the halo lanes (interior is fully overwritten), store the
        # bf16 interior lane-aligned, then extract the K*K shifted views with
        # static lane-offset slices.  Vertical out-of-bounds taps land in the
        # zeroed halo; only horizontal-wrap columns need the 2 edge masks.
        xpf_ref[:, :off0_al] = jnp.zeros((c, off0_al), jnp.bfloat16)
        xpf_ref[:, off0_al + HW:] = jnp.zeros((c, Lp - off0_al - HW), jnp.bfloat16)
        xpf_ref[:, off0_al:off0_al + HW] = src_f32.astype(jnp.bfloat16)
        for di in range(K):
            for dj in range(K):
                kk = di * K + dj
                off = (di - pad) * W + (dj - pad)
                tap = xpf_ref[:, off0_al + off:off0_al + off + HW]     # (c, HW) bf16
                if dj == pad:
                    pat_ref[kk * c:(kk + 1) * c, :] = tap
                else:
                    mrow = 0 if dj < pad else 1
                    pat_ref[kk * c:(kk + 1) * c, :] = tap * mask_ref[mrow:mrow + 1, :]

    def kernel(x_ref, vec_ref, noise_ref, mask_ref, w1_ref, w2_ref, wrgb_ref,
               prev_ref, xout_ref, rgbout_ref, xpf1, pat1, xpf2, pat2):
        # Packed per-batch vectors: [s1(cin), d1(F), wn1(F), s2(F), d2(F), wn2(F), srgb(F)]
        vec = vec_ref[0]                                              # (P, 1) f32
        s1 = vec[0:cin, :]
        d1 = vec[cin + 0 * F:cin + 1 * F, :]
        wn1 = vec[cin + 1 * F:cin + 2 * F, :]
        s2 = vec[cin + 2 * F:cin + 3 * F, :]
        d2 = vec[cin + 3 * F:cin + 4 * F, :]
        wn2 = vec[cin + 4 * F:cin + 5 * F, :]
        srgb = vec[cin + 5 * F:cin + 6 * F, :]
        noise = noise_ref[0].astype(jnp.float32)                      # (1, HW)

        # ---- conv1: modulate, im2col (bf16), one MXU matmul (f32 acc) -------
        xm = x_ref[0].astype(jnp.float32) * s1                        # (Cin, HW)
        build_patches(xm, cin, xpf1, pat1, mask_ref)
        act = jnp.dot(w1_ref[...], pat1[...],
                      preferred_element_type=jnp.float32)             # (F, HW)
        act = act * d1 + wn1 * noise                                  # demod + noise
        act = jnp.where(act >= 0.0, act, 0.2 * act)                   # LeakyReLU(0.2)

        # ---- conv2 ----------------------------------------------------------
        build_patches(act * s2, F, xpf2, pat2, mask_ref)
        act2 = jnp.dot(w2_ref[...], pat2[...],
                       preferred_element_type=jnp.float32)            # (F, HW)
        act2 = act2 * d2 + wn2 * noise
        act2 = jnp.where(act2 >= 0.0, act2, 0.2 * act2)
        xout_ref[0] = act2.astype(xout_ref.dtype)

        # ---- to_rgb: 1x1 modulated conv (no demod) + prev_rgb ---------------
        rgb = jnp.dot(wrgb_ref[...], (act2 * srgb).astype(jnp.bfloat16),
                      preferred_element_type=jnp.float32)             # (CH, HW)
        rgbout_ref[0] = (rgb + prev_ref[0].astype(jnp.float32)).astype(rgbout_ref.dtype)

    return kernel


# ---------------------------------------------------------------------------
# Bilinear x2 upsample (align_corners=False), NCHW, matches nn.Upsample.
# Implemented as two dense matmuls (MXU) instead of gathers.
# ---------------------------------------------------------------------------
def _up2_matrix(n):
    out = jnp.arange(2 * n, dtype=jnp.float32)
    src = jnp.maximum((out + 0.5) * 0.5 - 0.5, 0.0)
    i0f = jnp.floor(src)
    frac = src - i0f
    i0 = jnp.clip(i0f.astype(jnp.int32), 0, n - 1)
    i1 = jnp.minimum(i0 + 1, n - 1)
    return (jax.nn.one_hot(i0, n, dtype=jnp.float32) * (1.0 - frac)[:, None]
            + jax.nn.one_hot(i1, n, dtype=jnp.float32) * frac[:, None])   # (2n, n)


def upsample2x_nchw(x, out_dtype=None):
    B, C, H, W = x.shape
    uh = _up2_matrix(H).astype(jnp.bfloat16)                          # (2H, H)
    uw = _up2_matrix(W).astype(jnp.bfloat16)                          # (2W, W)
    y = jnp.einsum("bchw,pw->bchp", x.astype(jnp.bfloat16), uw,
                   preferred_element_type=jnp.float32)                # (B,C,H,2W)
    y = jnp.einsum("bchp,oh->bcop", y.astype(jnp.bfloat16), uh,
                   preferred_element_type=jnp.float32)                # (B,C,2H,2W)
    return y.astype(out_dtype if out_dtype is not None else x.dtype)


# ---------------------------------------------------------------------------
# Parameter initialization (deterministic, mirrors the module's shapes)
# ---------------------------------------------------------------------------
def init_params(key, latent_dim, in_ch, filters, channels):
    ks = jax.random.split(key, 8)

    def kaiming_conv(k, co, ci, kk):
        fan_in = ci * kk * kk
        return jax.random.normal(k, (co, ci, kk, kk), jnp.float32) * math.sqrt(2.0 / fan_in)

    def linear_w(k, fan_in, fan_out):
        bound = 1.0 / math.sqrt(fan_in)
        return jax.random.uniform(k, (fan_in, fan_out), jnp.float32, -bound, bound)

    return dict(
        ws1=linear_w(ks[0], latent_dim, in_ch),                              # to_style1
        wn1=jax.random.uniform(ks[1], (filters,), jnp.float32, -1.0, 1.0),   # to_noise1
        w_conv1=kaiming_conv(ks[2], filters, in_ch, K),                      # conv1
        ws2=linear_w(ks[3], latent_dim, filters),                            # to_style2
        wn2=jax.random.uniform(ks[4], (filters,), jnp.float32, -1.0, 1.0),   # to_noise2
        w_conv2=kaiming_conv(ks[5], filters, filters, K),                    # conv2
        ws_rgb=linear_w(ks[6], latent_dim, filters),                         # to_rgb.to_style
        w_rgb=kaiming_conv(ks[7], channels, filters, 1),                     # to_rgb.conv
    )


# ---------------------------------------------------------------------------
# GeneratorBlock forward (upsample=True, upsample_rgb=True, no biases)
# ---------------------------------------------------------------------------
def generator_block_forward(params, x_nchw, prev_rgb_nchw, istyle, inoise):
    filters = params["w_conv1"].shape[0]
    cin = params["w_conv1"].shape[1]

    x = upsample2x_nchw(x_nchw, out_dtype=IO_DTYPE)                   # self.upsample
    B, _, H, W = x.shape
    # NOTE: like the reference module, the noise permute only composes for H == W.
    assert H == W, "noise permute(0,3,2,1) emulation requires square feature maps"
    HW = H * W
    pad = (K - 1) // 2

    w1 = params["w_conv1"]                                            # (F, Cin, 3, 3)
    w2 = params["w_conv2"]                                            # (F, F, 3, 3)
    wrgb = params["w_rgb"]                                            # (CH, F, 1, 1)

    # Styles (+1) and hoisted demodulation scales (tiny JAX ops, done once).
    s1p = istyle @ params["ws1"] + 1.0                                # (B, Cin)
    s2p = istyle @ params["ws2"] + 1.0                                # (B, F)
    srgbp = istyle @ params["ws_rgb"] + 1.0                           # (B, F)
    wsq1 = jnp.sum(w1 * w1, axis=(2, 3))                              # (F, Cin)
    wsq2 = jnp.sum(w2 * w2, axis=(2, 3))                              # (F, F)
    d1 = jax.lax.rsqrt(jnp.einsum("bc,fc->bf", s1p * s1p, wsq1) + EPSILON)
    d2 = jax.lax.rsqrt(jnp.einsum("bc,fc->bf", s2p * s2p, wsq2) + EPSILON)

    # Pack ALL tiny per-batch vectors into one (B, P, 1) input.
    wn1_b = jnp.broadcast_to(params["wn1"][None, :], (B, filters))
    wn2_b = jnp.broadcast_to(params["wn2"][None, :], (B, filters))
    vec = jnp.concatenate([s1p, d1, wn1_b, s2p, d2, wn2_b, srgbp],
                          axis=1).astype(jnp.float32)                 # (B, cin + 6F)
    P = vec.shape[1]
    vec = vec.reshape(B, P, 1)

    # Conv weights flattened to (Cout, K*K*Cin) matching the im2col row order.
    w1_t = jnp.transpose(w1, (0, 2, 3, 1)).reshape(filters, K * K * cin).astype(jnp.bfloat16)
    w2_t = jnp.transpose(w2, (0, 2, 3, 1)).reshape(filters, K * K * filters).astype(jnp.bfloat16)
    wrgb_t = wrgb[:, :, 0, 0].astype(jnp.bfloat16)                    # (CH, F)

    # Edge masks: only horizontal wrap needs masking (row 0: dj<pad, row 1: dj>pad).
    jj = jnp.broadcast_to(jnp.arange(W)[None, :], (H, W)).reshape(1, HW)
    edge_mask = jnp.concatenate([(jj != 0), (jj != W - 1)],
                                axis=0).astype(jnp.bfloat16)          # (2, HW)

    # Noise plane: crop, apply PyTorch's permute(0,3,2,1) H/W swap, flatten.
    noise_flat = jnp.swapaxes(inoise[:, :H, :W, 0].astype(jnp.float32),
                              1, 2).reshape(B, 1, HW).astype(IO_DTYPE)

    if prev_rgb_nchw is None:
        prev_flat = jnp.zeros((B, CHANNELS, HW), IO_DTYPE)
    else:
        assert prev_rgb_nchw.shape == (B, CHANNELS, H, W), \
            "prev_rgb must already be at this block's post-upsample resolution"
        prev_flat = prev_rgb_nchw.reshape(B, CHANNELS, HW).astype(IO_DTYPE)

    # Lane-aligned flat-pad geometry.
    halo = pad * W + pad
    off0_al = _round_up(halo, 128)                                    # aligned interior start
    Lp = _round_up(off0_al + HW + halo, 128)                          # padded flat length

    # Explicit scoped-VMEM budget: scratch + 2x double-buffered (in + out) blocks.
    in_blocks = [((1, cin, HW), IO_DTYPE), ((1, P, 1), jnp.float32),
                 ((1, 1, HW), IO_DTYPE), ((2, HW), jnp.bfloat16),
                 ((filters, K * K * cin), jnp.bfloat16),
                 ((filters, K * K * filters), jnp.bfloat16),
                 ((CHANNELS, filters), jnp.bfloat16),
                 ((1, CHANNELS, HW), IO_DTYPE)]
    out_blocks = [((1, filters, HW), IO_DTYPE), ((1, CHANNELS, HW), IO_DTYPE)]
    scratch_blocks = [((cin, Lp), jnp.bfloat16), ((K * K * cin, HW), jnp.bfloat16),
                      ((filters, Lp), jnp.bfloat16), ((K * K * filters, HW), jnp.bfloat16)]
    need = (sum(_nbytes(s, d) for s, d in scratch_blocks)
            + 2 * sum(_nbytes(s, d) for s, d in in_blocks + out_blocks))
    vmem_limit = int(min(max(2 * need + (4 << 20), 32 << 20), 100 << 20))

    kernel = _make_generator_block_kernel(H, W, cin, filters, off0_al, Lp)
    x_flat, rgb_flat = pl.pallas_call(
        kernel,
        out_shape=(jax.ShapeDtypeStruct((B, filters, HW), IO_DTYPE),
                   jax.ShapeDtypeStruct((B, CHANNELS, HW), IO_DTYPE)),
        grid_spec=pltpu.PrefetchScalarGridSpec(
            num_scalar_prefetch=0,
            grid=(B,),
            in_specs=[
                pl.BlockSpec((1, cin, HW), lambda b: (b, 0, 0)),             # x (upsampled)
                pl.BlockSpec((1, P, 1), lambda b: (b, 0, 0)),                # packed vectors
                pl.BlockSpec((1, 1, HW), lambda b: (b, 0, 0)),               # noise plane
                pl.BlockSpec((2, HW), lambda b: (0, 0)),                     # edge masks
                pl.BlockSpec((filters, K * K * cin), lambda b: (0, 0)),      # w_conv1
                pl.BlockSpec((filters, K * K * filters), lambda b: (0, 0)),  # w_conv2
                pl.BlockSpec((CHANNELS, filters), lambda b: (0, 0)),         # w_rgb
                pl.BlockSpec((1, CHANNELS, HW), lambda b: (b, 0, 0)),        # prev_rgb
            ],
            out_specs=[
                pl.BlockSpec((1, filters, HW), lambda b: (b, 0, 0)),
                pl.BlockSpec((1, CHANNELS, HW), lambda b: (b, 0, 0)),
            ],
            scratch_shapes=[
                pltpu.VMEM((cin, Lp), jnp.bfloat16),                 # flat-padded act (conv1)
                pltpu.VMEM((K * K * cin, HW), jnp.bfloat16),         # im2col (conv1)
                pltpu.VMEM((filters, Lp), jnp.bfloat16),             # flat-padded act (conv2)
                pltpu.VMEM((K * K * filters, HW), jnp.bfloat16),     # im2col (conv2)
            ]),
        compiler_params=pltpu.CompilerParams(
            dimension_semantics=("parallel",),
            vmem_limit_bytes=vmem_limit),
    )(x.reshape(B, cin, HW), vec, noise_flat, edge_mask,
      w1_t, w2_t, wrgb_t, prev_flat)

    x_out = x_flat.reshape(B, filters, H, W)                          # NCHW, bf16
    rgb = upsample2x_nchw(rgb_flat.reshape(B, CHANNELS, H, W),        # upsample_rgb
                          out_dtype=IO_DTYPE)
    return x_out, rgb


if __name__ == "__main__":
    key = jax.random.PRNGKey(0)
    B, latent_dim, in_ch, filters = 2, 32, 4, 8
    H0 = W0 = 8                              # upsampled to 16x16 inside the block

    k_p, k_x, k_prev, k_style, k_noise = jax.random.split(key, 5)
    params = init_params(k_p, latent_dim, in_ch, filters, CHANNELS)

    x = jax.random.normal(k_x, (B, in_ch, H0, W0), jnp.float32)               # NCHW
    prev_rgb = jax.random.normal(k_prev, (B, CHANNELS, 2 * H0, 2 * W0), jnp.float32)
    istyle = jax.random.normal(k_style, (B, latent_dim), jnp.float32)
    inoise = jax.random.uniform(k_noise, (B, 2 * H0, 2 * W0, 1), jnp.float32)

    x_out, rgb_out = generator_block_forward(params, x, prev_rgb, istyle, inoise)
    jax.block_until_ready((x_out, rgb_out))

    assert x_out.shape == (B, filters, 2 * H0, 2 * W0)
    assert rgb_out.shape == (B, CHANNELS, 4 * H0, 4 * W0)
    print("KERNEL_OK")
</pallas_src>

<mosaic_0001>
module attributes {stable_mosaic.version = 11 : i64} {
  func.func @kernel(%arg0: i32, %arg1: memref<1x4x256xbf16, #tpu.memory_space<vmem>>, %arg2: memref<1x52x1xf32, #tpu.memory_space<vmem>>, %arg3: memref<1x1x256xbf16, #tpu.memory_space<vmem>>, %arg4: memref<2x256xbf16, #tpu.memory_space<vmem>>, %arg5: memref<8x36xbf16, #tpu.memory_space<vmem>>, %arg6: memref<8x72xbf16, #tpu.memory_space<vmem>>, %arg7: memref<3x8xbf16, #tpu.memory_space<vmem>>, %arg8: memref<1x3x256xbf16, #tpu.memory_space<vmem>>, %arg9: memref<1x8x256xbf16, #tpu.memory_space<vmem>>, %arg10: memref<1x3x256xbf16, #tpu.memory_space<vmem>>, %arg11: memref<4x512xbf16, #tpu.memory_space<vmem>>, %arg12: memref<36x256xbf16, #tpu.memory_space<vmem>>, %arg13: memref<8x512xbf16, #tpu.memory_space<vmem>>, %arg14: memref<72x256xbf16, #tpu.memory_space<vmem>>) attributes {dimension_semantics = [#tpu.dimension_semantics<parallel>], iteration_bounds = array<i64: 2>, scalar_prefetch = 0 : i64, scratch_operands = 4 : i64, tpu.core_type = #tpu.core_type<tc>, window_params = [{transform_indices = @transform_0, window_bounds = array<i64: 1, 4, 256>}, {transform_indices = @transform_1, window_bounds = array<i64: 1, 52, 1>}, {transform_indices = @transform_2, window_bounds = array<i64: 1, 1, 256>}, {pipeline_mode = #tpu.pipeline_mode<synchronous>, transform_indices = @transform_3, window_bounds = array<i64: 2, 256>}, {pipeline_mode = #tpu.pipeline_mode<synchronous>, transform_indices = @transform_4, window_bounds = array<i64: 8, 36>}, {pipeline_mode = #tpu.pipeline_mode<synchronous>, transform_indices = @transform_5, window_bounds = array<i64: 8, 72>}, {pipeline_mode = #tpu.pipeline_mode<synchronous>, transform_indices = @transform_6, window_bounds = array<i64: 3, 8>}, {transform_indices = @transform_7, window_bounds = array<i64: 1, 3, 256>}, {transform_indices = @transform_8, window_bounds = array<i64: 1, 8, 256>}, {transform_indices = @transform_9, window_bounds = array<i64: 1, 3, 256>}]} {
    %c0 = arith.constant 0 : index
    %c0_0 = arith.constant 0 : index
    %c0_1 = arith.constant 0 : index
    %0 = vector.load %arg2[%c0, %c0_0, %c0_1] : memref<1x52x1xf32, #tpu.memory_space<vmem>>, vector<1x52x1xf32>
    %1 = vector.shape_cast %0 : vector<1x52x1xf32> to vector<52x1xf32>
    %2 = vector.extract_strided_slice %1 {offsets = [0, 0], sizes = [4, 1], strides = [1, 1]} : vector<52x1xf32> to vector<4x1xf32>
    %3 = vector.extract_strided_slice %1 {offsets = [4, 0], sizes = [8, 1], strides = [1, 1]} : vector<52x1xf32> to vector<8x1xf32>
    %4 = vector.extract_strided_slice %1 {offsets = [12, 0], sizes = [8, 1], strides = [1, 1]} : vector<52x1xf32> to vector<8x1xf32>
    %5 = vector.extract_strided_slice %1 {offsets = [20, 0], sizes = [8, 1], strides = [1, 1]} : vector<52x1xf32> to vector<8x1xf32>
    %6 = vector.extract_strided_slice %1 {offsets = [28, 0], sizes = [8, 1], strides = [1, 1]} : vector<52x1xf32> to vector<8x1xf32>
    %7 = vector.extract_strided_slice %1 {offsets = [36, 0], sizes = [8, 1], strides = [1, 1]} : vector<52x1xf32> to vector<8x1xf32>
    %8 = vector.extract_strided_slice %1 {offsets = [44, 0], sizes = [8, 1], strides = [1, 1]} : vector<52x1xf32> to vector<8x1xf32>
    %c0_2 = arith.constant 0 : index
    %c0_3 = arith.constant 0 : index
    %c0_4 = arith.constant 0 : index
    %9 = vector.load %arg3[%c0_2, %c0_3, %c0_4] : memref<1x1x256xbf16, #tpu.memory_space<vmem>>, vector<1x1x256xbf16>
    %10 = vector.shape_cast %9 : vector<1x1x256xbf16> to vector<1x256xbf16>
    %11 = arith.extf %10 : vector<1x256xbf16> to vector<1x256xf32>
    %c0_5 = arith.constant 0 : index
    %c0_6 = arith.constant 0 : index
    %c0_7 = arith.constant 0 : index
    %12 = vector.load %arg1[%c0_5, %c0_6, %c0_7] : memref<1x4x256xbf16, #tpu.memory_space<vmem>>, vector<1x4x256xbf16>
    %13 = vector.shape_cast %12 : vector<1x4x256xbf16> to vector<4x256xbf16>
    %14 = arith.extf %13 : vector<4x256xbf16> to vector<4x256xf32>
    %15 = vector.broadcast %2 : vector<4x1xf32> to vector<4x256xf32>
    %16 = arith.mulf %14, %15 : vector<4x256xf32>
    %cst = arith.constant 0.000000e+00 : bf16
    %17 = vector.broadcast %cst : bf16 to vector<4x128xbf16>
    %c0_8 = arith.constant 0 : index
    %c0_9 = arith.constant 0 : index
    %18 = vector.load %arg11[%c0_8, %c0_9] : memref<4x512xbf16, #tpu.memory_space<vmem>>, vector<4x128xbf16>
    tpu.vector_store %arg11[%c0_8, %c0_9], %17 {strides = array<i32>} : memref<4x512xbf16, #tpu.memory_space<vmem>>, vector<4x128xbf16>,
    %cst_10 = arith.constant 0.000000e+00 : bf16
    %19 = vector.broadcast %cst_10 : bf16 to vector<4x128xbf16>
    %c0_11 = arith.constant 0 : index
    %c384 = arith.constant 384 : index
    %20 = vector.load %arg11[%c0_11, %c384] : memref<4x512xbf16, #tpu.memory_space<vmem>>, vector<4x128xbf16>
    tpu.vector_store %arg11[%c0_11, %c384], %19 {strides = array<i32>} : memref<4x512xbf16, #tpu.memory_space<vmem>>, vector<4x128xbf16>,
    %21 = arith.truncf %16 : vector<4x256xf32> to vector<4x256xbf16>
    %c0_12 = arith.constant 0 : index
    %c128 = arith.constant 128 : index
    %22 = vector.load %arg11[%c0_12, %c128] : memref<4x512xbf16, #tpu.memory_space<vmem>>, vector<4x256xbf16>
    tpu.vector_store %arg11[%c0_12, %c128], %21 {strides = array<i32>} : memref<4x512xbf16, #tpu.memory_space<vmem>>, vector<4x256xbf16>,
    %c0_13 = arith.constant 0 : index
    %c111 = arith.constant 111 : index
    %23 = vector.load %arg11[%c0_13, %c111] : memref<4x512xbf16, #tpu.memory_space<vmem>>, vector<4x256xbf16>
    %c0_14 = arith.constant 0 : index
    %c0_15 = arith.constant 0 : index
    %24 = vector.load %arg4[%c0_14, %c0_15] : memref<2x256xbf16, #tpu.memory_space<vmem>>, vector<1x256xbf16>
    %25 = vector.broadcast %24 : vector<1x256xbf16> to vector<4x256xbf16>
    %26 = arith.mulf %23, %25 : vector<4x256xbf16>
    %c0_16 = arith.constant 0 : index
    %c0_17 = arith.constant 0 : index
    %27 = vector.load %arg12[%c0_16, %c0_17] : memref<36x256xbf16, #tpu.memory_space<vmem>>, vector<4x256xbf16>
    tpu.vector_store %arg12[%c0_16, %c0_17], %26 {strides = array<i32>} : memref<36x256xbf16, #tpu.memory_space<vmem>>, vector<4x256xbf16>,
    %c0_18 = arith.constant 0 : index
    %c112 = arith.constant 112 : index
    %28 = vector.load %arg11[%c0_18, %c112] : memref<4x512xbf16, #tpu.memory_space<vmem>>, vector<4x256xbf16>
    %c4 = arith.constant 4 : index
    %c0_19 = arith.constant 0 : index
    %29 = vector.load %arg12[%c4, %c0_19] : memref<36x256xbf16, #tpu.memory_space<vmem>>, vector<4x256xbf16>
    tpu.vector_store %arg12[%c4, %c0_19], %28 {strides = array<i32>} : memref<36x256xbf16, #tpu.memory_space<vmem>>, vector<4x256xbf16>,
    %c0_20 = arith.constant 0 : index
    %c113 = arith.constant 113 : index
    %30 = vector.load %arg11[%c0_20, %c113] : memref<4x512xbf16, #tpu.memory_space<vmem>>, vector<4x256xbf16>
    %c1 = arith.constant 1 : index
    %c0_21 = arith.constant 0 : index
    %31 = vector.load %arg4[%c1, %c0_21] : memref<2x256xbf16, #tpu.memory_space<vmem>>, vector<1x256xbf16>
    %32 = vector.broadcast %31 : vector<1x256xbf16> to vector<4x256xbf16>
    %33 = arith.mulf %30, %32 : vector<4x256xbf16>
    %c8 = arith.constant 8 : index
    %c0_22 = arith.constant 0 : index
    %34 = vector.load %arg12[%c8, %c0_22] : memref<36x256xbf16, #tpu.memory_space<vmem>>, vector<4x256xbf16>
    tpu.vector_store %arg12[%c8, %c0_22], %33 {strides = array<i32>} : memref<36x256xbf16, #tpu.memory_space<vmem>>, vector<4x256xbf16>,
    %c0_23 = arith.constant 0 : index
    %c127 = arith.constant 127 : index
    %35 = vector.load %arg11[%c0_23, %c127] : memref<4x512xbf16, #tpu.memory_space<vmem>>, vector<4x256xbf16>
    %c0_24 = arith.constant 0 : index
    %c0_25 = arith.constant 0 : index
    %36 = vector.load %arg4[%c0_24, %c0_25] : memref<2x256xbf16, #tpu.memory_space<vmem>>, vector<1x256xbf16>
    %37 = vector.broadcast %36 : vector<1x256xbf16> to vector<4x256xbf16>
    %38 = arith.mulf %35, %37 : vector<4x256xbf16>
    %c12 = arith.constant 12 : index
    %c0_26 = arith.constant 0 : index
    %39 = vector.load %arg12[%c12, %c0_26] : memref<36x256xbf16, #tpu.memory_space<vmem>>, vector<4x256xbf16>
    tpu.vector_store %arg12[%c12, %c0_26], %38 {strides = array<i32>} : memref<36x256xbf16, #tpu.memory_space<vmem>>, vector<4x256xbf16>,
    %c0_27 = arith.constant 0 : index
    %c128_28 = arith.constant 128 : index
    %40 = vector.load %arg11[%c0_27, %c128_28] : memref<4x512xbf16, #tpu.memory_space<vmem>>, vector<4x256xbf16>
    %c16 = arith.constant 16 : index
    %c0_29 = arith.constant 0 : index
    %41 = vector.load %arg12[%c16, %c0_29] : memref<36x256xbf16, #tpu.memory_space<vmem>>, vector<4x256xbf16>
    tpu.vector_store %arg12[%c16, %c0_29], %40 {strides = array<i32>} : memref<36x256xbf16, #tpu.memory_space<vmem>>, vector<4x256xbf16>,
    %c0_30 = arith.constant 0 : index
    %c129 = arith.constant 129 : index
    %42 = vector.load %arg11[%c0_30, %c129] : memref<4x512xbf16, #tpu.memory_space<vmem>>, vector<4x256xbf16>
    %c1_31 = arith.constant 1 : index
    %c0_32 = arith.constant 0 : index
    %43 = vector.load %arg4[%c1_31, %c0_32] : memref<2x256xbf16, #tpu.memory_space<vmem>>, vector<1x256xbf16>
    %44 = vector.broadcast %43 : vector<1x256xbf16> to vector<4x256xbf16>
    %45 = arith.mulf %42, %44 : vector<4x256xbf16>
    %c20 = arith.constant 20 : index
    %c0_33 = arith.constant 0 : index
    %46 = vector.load %arg12[%c20, %c0_33] : memref<36x256xbf16, #tpu.memory_space<vmem>>, vector<4x256xbf16>
    tpu.vector_store %arg12[%c20, %c0_33], %45 {strides = array<i32>} : memref<36x256xbf16, #tpu.memory_space<vmem>>, vector<4x256xbf16>,
    %c0_34 = arith.constant 0 : index
    %c143 = arith.constant 143 : index
    %47 = vector.load %arg11[%c0_34, %c143] : memref<4x512xbf16, #tpu.memory_space<vmem>>, vector<4x256xbf16>
    %c0_35 = arith.constant 0 : index
    %c0_36 = arith.constant 0 : index
    %48 = vector.load %arg4[%c0_35, %c0_36] : memref<2x256xbf16, #tpu.memory_space<vmem>>, vector<1x256xbf16>
    %49 = vector.broadcast %48 : vector<1x256xbf16> to vector<4x256xbf16>
    %50 = arith.mulf %47, %49 : vector<4x256xbf16>
    %c24 = arith.constant 24 : index
    %c0_37 = arith.constant 0 : index
    %51 = vector.load %arg12[%c24, %c0_37] : memref<36x256xbf16, #tpu.memory_space<vmem>>, vector<4x256xbf16>
    tpu.vector_store %arg12[%c24, %c0_37], %50 {strides = array<i32>} : memref<36x256xbf16, #tpu.memory_space<vmem>>, vector<4x256xbf16>,
    %c0_38 = arith.constant 0 : index
    %c144 = arith.constant 144 : index
    %52 = vector.load %arg11[%c0_38, %c144] : memref<4x512xbf16, #tpu.memory_space<vmem>>, vector<4x256xbf16>
    %c28 = arith.constant 28 : index
    %c0_39 = arith.constant 0 : index
    %53 = vector.load %arg12[%c28, %c0_39] : memref<36x256xbf16, #tpu.memory_space<vmem>>, vector<4x256xbf16>
    tpu.vector_store %arg12[%c28, %c0_39], %52 {strides = array<i32>} : memref<36x256xbf16, #tpu.memory_space<vmem>>, vector<4x256xbf16>,
    %c0_40 = arith.constant 0 : index
    %c145 = arith.constant 145 : index
    %54 = vector.load %arg11[%c0_40, %c145] : memref<4x512xbf16, #tpu.memory_space<vmem>>, vector<4x256xbf16>
    %c1_41 = arith.constant 1 : index
    %c0_42 = arith.constant 0 : index
    %55 = vector.load %arg4[%c1_41, %c0_42] : memref<2x256xbf16, #tpu.memory_space<vmem>>, vector<1x256xbf16>
    %56 = vector.broadcast %55 : vector<1x256xbf16> to vector<4x256xbf16>
    %57 = arith.mulf %54, %56 : vector<4x256xbf16>
    %c32 = arith.constant 32 : index
    %c0_43 = arith.constant 0 : index
    %58 = vector.load %arg12[%c32, %c0_43] : memref<36x256xbf16, #tpu.memory_space<vmem>>, vector<4x256xbf16>
    tpu.vector_store %arg12[%c32, %c0_43], %57 {strides = array<i32>} : memref<36x256xbf16, #tpu.memory_space<vmem>>, vector<4x256xbf16>,
    %c0_44 = arith.constant 0 : index
    %c0_45 = arith.constant 0 : index
    %59 = vector.load %arg5[%c0_44, %c0_45] : memref<8x36xbf16, #tpu.memory_space<vmem>>, vector<8x36xbf16>
    %c0_46 = arith.constant 0 : index
    %c0_47 = arith.constant 0 : index
    %60 = vector.load %arg12[%c0_46, %c0_47] : memref<36x256xbf16, #tpu.memory_space<vmem>>, vector<36x256xbf16>
    %cst_48 = arith.constant dense<0.000000e+00> : vector<8x256xf32>
    %61 = tpu.matmul %59, %60, %cst_48 {dimension_numbers = #tpu.dot_dimension_numbers<[1], [0], [0], [1], [0, 0, 1, 1], [], []>} : vector<8x36xbf16>, vector<36x256xbf16>, vector<8x256xf32> -> vector<8x256xf32>
    %62 = vector.broadcast %3 : vector<8x1xf32> to vector<8x256xf32>
    %63 = arith.mulf %61, %62 : vector<8x256xf32>
    %64 = vector.broadcast %4 : vector<8x1xf32> to vector<8x256xf32>
    %65 = vector.broadcast %11 : vector<1x256xf32> to vector<8x256xf32>
    %66 = arith.mulf %64, %65 : vector<8x256xf32>
    %67 = arith.addf %63, %66 : vector<8x256xf32>
    %cst_49 = arith.constant 0.000000e+00 : f32
    %68 = vector.broadcast %cst_49 : f32 to vector<8x256xf32>
    %69 = arith.cmpf oge, %67, %68 : vector<8x256xf32>
    %cst_50 = arith.constant 2.000000e-01 : f32
    %70 = vector.broadcast %cst_50 : f32 to vector<8x256xf32>
    %71 = arith.mulf %70, %67 : vector<8x256xf32>
    %72 = arith.select %69, %67, %71 : vector<8x256xi1>, vector<8x256xf32>
    %73 = vector.broadcast %5 : vector<8x1xf32> to vector<8x256xf32>
    %74 = arith.mulf %72, %73 : vector<8x256xf32>
    %cst_51 = arith.constant 0.000000e+00 : bf16
    %75 = vector.broadcast %cst_51 : bf16 to vector<8x128xbf16>
    %c0_52 = arith.constant 0 : index
    %c0_53 = arith.constant 0 : index
    %76 = vector.load %arg13[%c0_52, %c0_53] : memref<8x512xbf16, #tpu.memory_space<vmem>>, vector<8x128xbf16>
    tpu.vector_store %arg13[%c0_52, %c0_53], %75 {strides = array<i32>} : memref<8x512xbf16, #tpu.memory_space<vmem>>, vector<8x128xbf16>,
    %cst_54 = arith.constant 0.000000e+00 : bf16
    %77 = vector.broadcast %cst_54 : bf16 to vector<8x128xbf16>
    %c0_55 = arith.constant 0 : index
    %c384_56 = arith.constant 384 : index
    %78 = vector.load %arg13[%c0_55, %c384_56] : memref<8x512xbf16, #tpu.memory_space<vmem>>, vector<8x128xbf16>
    tpu.vector_store %arg13[%c0_55, %c384_56], %77 {strides = array<i32>} : memref<8x512xbf16, #tpu.memory_space<vmem>>, vector<8x128xbf16>,
    %79 = arith.truncf %74 : vector<8x256xf32> to vector<8x256xbf16>
    %c0_57 = arith.constant 0 : index
    %c128_58 = arith.constant 128 : index
    %80 = vector.load %arg13[%c0_57, %c128_58] : memref<8x512xbf16, #tpu.memory_space<vmem>>, vector<8x256xbf16>
    tpu.vector_store %arg13[%c0_57, %c128_58], %79 {strides = array<i32>} : memref<8x512xbf16, #tpu.memory_space<vmem>>, vector<8x256xbf16>,
    %c0_59 = arith.constant 0 : index
    %c111_60 = arith.constant 111 : index
    %81 = vector.load %arg13[%c0_59, %c111_60] : memref<8x512xbf16, #tpu.memory_space<vmem>>, vector<8x256xbf16>
    %c0_61 = arith.constant 0 : index
    %c0_62 = arith.constant 0 : index
    %82 = vector.load %arg4[%c0_61, %c0_62] : memref<2x256xbf16, #tpu.memory_space<vmem>>, vector<1x256xbf16>
    %83 = vector.broadcast %82 : vector<1x256xbf16> to vector<8x256xbf16>
    %84 = arith.mulf %81, %83 : vector<8x256xbf16>
    %c0_63 = arith.constant 0 : index
    %c0_64 = arith.constant 0 : index
    %85 = vector.load %arg14[%c0_63, %c0_64] : memref<72x256xbf16, #tpu.memory_space<vmem>>, vector<8x256xbf16>
    tpu.vector_store %arg14[%c0_63, %c0_64], %84 {strides = array<i32>} : memref<72x256xbf16, #tpu.memory_space<vmem>>, vector<8x256xbf16>,
    %c0_65 = arith.constant 0 : index
    %c112_66 = arith.constant 112 : index
    %86 = vector.load %arg13[%c0_65, %c112_66] : memref<8x512xbf16, #tpu.memory_space<vmem>>, vector<8x256xbf16>
    %c8_67 = arith.constant 8 : index
    %c0_68 = arith.constant 0 : index
    %87 = vector.load %arg14[%c8_67, %c0_68] : memref<72x256xbf16, #tpu.memory_space<vmem>>, vector<8x256xbf16>
    tpu.vector_store %arg14[%c8_67, %c0_68], %86 {strides = array<i32>} : memref<72x256xbf16, #tpu.memory_space<vmem>>, vector<8x256xbf16>,
    %c0_69 = arith.constant 0 : index
    %c113_70 = arith.constant 113 : index
    %88 = vector.load %arg13[%c0_69, %c113_70] : memref<8x512xbf16, #tpu.memory_space<vmem>>, vector<8x256xbf16>
    %c1_71 = arith.constant 1 : index
    %c0_72 = arith.constant 0 : index
    %89 = vector.load %arg4[%c1_71, %c0_72] : memref<2x256xbf16, #tpu.memory_space<vmem>>, vector<1x256xbf16>
    %90 = vector.broadcast %89 : vector<1x256xbf16> to vector<8x256xbf16>
    %91 = arith.mulf %88, %90 : vector<8x256xbf16>
    %c16_73 = arith.constant 16 : index
    %c0_74 = arith.constant 0 : index
    %92 = vector.load %arg14[%c16_73, %c0_74] : memref<72x256xbf16, #tpu.memory_space<vmem>>, vector<8x256xbf16>
    tpu.vector_store %arg14[%c16_73, %c0_74], %91 {strides = array<i32>} : memref<72x256xbf16, #tpu.memory_space<vmem>>, vector<8x256xbf16>,
    %c0_75 = arith.constant 0 : index
    %c127_76 = arith.constant 127 : index
    %93 = vector.load %arg13[%c0_75, %c127_76] : memref<8x512xbf16, #tpu.memory_space<vmem>>, vector<8x256xbf16>
    %c0_77 = arith.constant 0 : index
    %c0_78 = arith.constant 0 : index
    %94 = vector.load %arg4[%c0_77, %c0_78] : memref<2x256xbf16, #tpu.memory_space<vmem>>, vector<1x256xbf16>
    %95 = vector.broadcast %94 : vector<1x256xbf16> to vector<8x256xbf16>
    %96 = arith.mulf %93, %95 : vector<8x256xbf16>
    %c24_79 = arith.constant 24 : index
    %c0_80 = arith.constant 0 : index
    %97 = vector.load %arg14[%c24_79, %c0_80] : memref<72x256xbf16, #tpu.memory_space<vmem>>, vector<8x256xbf16>
    tpu.vector_store %arg14[%c24_79, %c0_80], %96 {strides = array<i32>} : memref<72x256xbf16, #tpu.memory_space<vmem>>, vector<8x256xbf16>,
    %c0_81 = arith.constant 0 : index
    %c128_82 = arith.constant 128 : index
    %98 = vector.load %arg13[%c0_81, %c128_82] : memref<8x512xbf16, #tpu.memory_space<vmem>>, vector<8x256xbf16>
    %c32_83 = arith.constant 32 : index
    %c0_84 = arith.constant 0 : index
    %99 = vector.load %arg14[%c32_83, %c0_84] : memref<72x256xbf16, #tpu.memory_space<vmem>>, vector<8x256xbf16>
    tpu.vector_store %arg14[%c32_83, %c0_84], %98 {strides = array<i32>} : memref<72x256xbf16, #tpu.memory_space<vmem>>, vector<8x256xbf16>,
    %c0_85 = arith.constant 0 : index
    %c129_86 = arith.constant 129 : index
    %100 = vector.load %arg13[%c0_85, %c129_86] : memref<8x512xbf16, #tpu.memory_space<vmem>>, vector<8x256xbf16>
    %c1_87 = arith.constant 1 : index
    %c0_88 = arith.constant 0 : index
    %101 = vector.load %arg4[%c1_87, %c0_88] : memref<2x256xbf16, #tpu.memory_space<vmem>>, vector<1x256xbf16>
    %102 = vector.broadcast %101 : vector<1x256xbf16> to vector<8x256xbf16>
    %103 = arith.mulf %100, %102 : vector<8x256xbf16>
    %c40 = arith.constant 40 : index
    %c0_89 = arith.constant 0 : index
    %104 = vector.load %arg14[%c40, %c0_89] : memref<72x256xbf16, #tpu.memory_space<vmem>>, vector<8x256xbf16>
    tpu.vector_store %arg14[%c40, %c0_89], %103 {strides = array<i32>} : memref<72x256xbf16, #tpu.memory_space<vmem>>, vector<8x256xbf16>,
    %c0_90 = arith.constant 0 : index
    %c143_91 = arith.constant 143 : index
    %105 = vector.load %arg13[%c0_90, %c143_91] : memref<8x512xbf16, #tpu.memory_space<vmem>>, vector<8x256xbf16>
    %c0_92 = arith.constant 0 : index
    %c0_93 = arith.constant 0 : index
    %106 = vector.load %arg4[%c0_92, %c0_93] : memref<2x256xbf16, #tpu.memory_space<vmem>>, vector<1x256xbf16>
    %107 = vector.broadcast %106 : vector<1x256xbf16> to vector<8x256xbf16>
    %108 = arith.mulf %105, %107 : vector<8x256xbf16>
    %c48 = arith.constant 48 : index
    %c0_94 = arith.constant 0 : index
    %109 = vector.load %arg14[%c48, %c0_94] : memref<72x256xbf16, #tpu.memory_space<vmem>>, vector<8x256xbf16>
    tpu.vector_store %arg14[%c48, %c0_94], %108 {strides = array<i32>} : memref<72x256xbf16, #tpu.memory_space<vmem>>, vector<8x256xbf16>,
    %c0_95 = arith.constant 0 : index
    %c144_96 = arith.constant 144 : index
    %110 = vector.load %arg13[%c0_95, %c144_96] : memref<8x512xbf16, #tpu.memory_space<vmem>>, vector<8x256xbf16>
    %c56 = arith.constant 56 : index
    %c0_97 = arith.constant 0 : index
    %111 = vector.load %arg14[%c56, %c0_97] : memref<72x256xbf16, #tpu.memory_space<vmem>>, vector<8x256xbf16>
    tpu.vector_store %arg14[%c56, %c0_97], %110 {strides = array<i32>} : memref<72x256xbf16, #tpu.memory_space<vmem>>, vector<8x256xbf16>,
    %c0_98 = arith.constant 0 : index
    %c145_99 = arith.constant 145 : index
    %112 = vector.load %arg13[%c0_98, %c145_99] : memref<8x512xbf16, #tpu.memory_space<vmem>>, vector<8x256xbf16>
    %c1_100 = arith.constant 1 : index
    %c0_101 = arith.constant 0 : index
    %113 = vector.load %arg4[%c1_100, %c0_101] : memref<2x256xbf16, #tpu.memory_space<vmem>>, vector<1x256xbf16>
    %114 = vector.broadcast %113 : vector<1x256xbf16> to vector<8x256xbf16>
    %115 = arith.mulf %112, %114 : vector<8x256xbf16>
    %c64 = arith.constant 64 : index
    %c0_102 = arith.constant 0 : index
    %116 = vector.load %arg14[%c64, %c0_102] : memref<72x256xbf16, #tpu.memory_space<vmem>>, vector<8x256xbf16>
    tpu.vector_store %arg14[%c64, %c0_102], %115 {strides = array<i32>} : memref<72x256xbf16, #tpu.memory_space<vmem>>, vector<8x256xbf16>,
    %c0_103 = arith.constant 0 : index
    %c0_104 = arith.constant 0 : index
    %117 = vector.load %arg6[%c0_103, %c0_104] : memref<8x72xbf16, #tpu.memory_space<vmem>>, vector<8x72xbf16>
    %c0_105 = arith.constant 0 : index
    %c0_106 = arith.constant 0 : index
    %118 = vector.load %arg14[%c0_105, %c0_106] : memref<72x256xbf16, #tpu.memory_space<vmem>>, vector<72x256xbf16>
    %cst_107 = arith.constant dense<0.000000e+00> : vector<8x256xf32>
    %119 = tpu.matmul %117, %118, %cst_107 {dimension_numbers = #tpu.dot_dimension_numbers<[1], [0], [0], [1], [0, 0, 1, 1], [], []>} : vector<8x72xbf16>, vector<72x256xbf16>, vector<8x256xf32> -> vector<8x256xf32>
    %120 = vector.broadcast %6 : vector<8x1xf32> to vector<8x256xf32>
    %121 = arith.mulf %119, %120 : vector<8x256xf32>
    %122 = vector.broadcast %7 : vector<8x1xf32> to vector<8x256xf32>
    %123 = vector.broadcast %11 : vector<1x256xf32> to vector<8x256xf32>
    %124 = arith.mulf %122, %123 : vector<8x256xf32>
    %125 = arith.addf %121, %124 : vector<8x256xf32>
    %cst_108 = arith.constant 0.000000e+00 : f32
    %126 = vector.broadcast %cst_108 : f32 to vector<8x256xf32>
    %127 = arith.cmpf oge, %125, %126 : vector<8x256xf32>
    %cst_109 = arith.constant 2.000000e-01 : f32
    %128 = vector.broadcast %cst_109 : f32 to vector<8x256xf32>
    %129 = arith.mulf %128, %125 : vector<8x256xf32>
    %130 = arith.select %127, %125, %129 : vector<8x256xi1>, vector<8x256xf32>
    %131 = arith.truncf %130 : vector<8x256xf32> to vector<8x256xbf16>
    %c0_110 = arith.constant 0 : index
    %c0_111 = arith.constant 0 : index
    %c0_112 = arith.constant 0 : index
    %132 = vector.load %arg9[%c0_110, %c0_111, %c0_112] : memref<1x8x256xbf16, #tpu.memory_space<vmem>>, vector<1x8x256xbf16>
    %133 = vector.shape_cast %132 : vector<1x8x256xbf16> to vector<8x256xbf16>
    %134 = vector.shape_cast %131 : vector<8x256xbf16> to vector<1x8x256xbf16>
    tpu.vector_store %arg9[%c0_110, %c0_111, %c0_112], %134 {strides = array<i32>} : memref<1x8x256xbf16, #tpu.memory_space<vmem>>, vector<1x8x256xbf16>,
    %c0_113 = arith.constant 0 : index
    %c0_114 = arith.constant 0 : index
    %135 = vector.load %arg7[%c0_113, %c0_114] : memref<3x8xbf16, #tpu.memory_space<vmem>>, vector<3x8xbf16>
    %136 = vector.broadcast %8 : vector<8x1xf32> to vector<8x256xf32>
    %137 = arith.mulf %130, %136 : vector<8x256xf32>
    %138 = arith.truncf %137 : vector<8x256xf32> to vector<8x256xbf16>
    %cst_115 = arith.constant dense<0.000000e+00> : vector<3x256xf32>
    %139 = tpu.matmul %135, %138, %cst_115 {dimension_numbers = #tpu.dot_dimension_numbers<[1], [0], [0], [1], [0, 0, 1, 1], [], []>} : vector<3x8xbf16>, vector<8x256xbf16>, vector<3x256xf32> -> vector<3x256xf32>
    %c0_116 = arith.constant 0 : index
    %c0_117 = arith.constant 0 : index
    %c0_118 = arith.constant 0 : index
    %140 = vector.load %arg8[%c0_116, %c0_117, %c0_118] : memref<1x3x256xbf16, #tpu.memory_space<vmem>>, vector<1x3x256xbf16>
    %141 = vector.shape_cast %140 : vector<1x3x256xbf16> to vector<3x256xbf16>
    %142 = arith.extf %141 : vector<3x256xbf16> to vector<3x256xf32>
    %143 = arith.addf %139, %142 : vector<3x256xf32>
    %144 = arith.truncf %143 : vector<3x256xf32> to vector<3x256xbf16>
    %c0_119 = arith.constant 0 : index
    %c0_120 = arith.constant 0 : index
    %c0_121 = arith.constant 0 : index
    %145 = vector.load %arg10[%c0_119, %c0_120, %c0_121] : memref<1x3x256xbf16, #tpu.memory_space<vmem>>, vector<1x3x256xbf16>
    %146 = vector.shape_cast %145 : vector<1x3x256xbf16> to vector<3x256xbf16>
    %147 = vector.shape_cast %144 : vector<3x256xbf16> to vector<1x3x256xbf16>
    tpu.vector_store %arg10[%c0_119, %c0_120, %c0_121], %147 {strides = array<i32>} : memref<1x3x256xbf16, #tpu.memory_space<vmem>>, vector<1x3x256xbf16>,
    return
  }
  func.func @transform_0(%arg0: i32) -> (i32, i32, i32) {
    %c0_i32 = arith.constant 0 : i32
    %c0_i32_0 = arith.constant 0 : i32
    %c0_i32_1 = arith.constant 0 : i32
    return %arg0, %c0_i32, %c0_i32_0 : i32, i32, i32
  }
  func.func @transform_1(%arg0: i32) -> (i32, i32, i32) {
    %c0_i32 = arith.constant 0 : i32
    %c0_i32_0 = arith.constant 0 : i32
    %c0_i32_1 = arith.constant 0 : i32
    return %arg0, %c0_i32, %c0_i32_0 : i32, i32, i32
  }
  func.func @transform_2(%arg0: i32) -> (i32, i32, i32) {
    %c0_i32 = arith.constant 0 : i32
    %c0_i32_0 = arith.constant 0 : i32
    %c0_i32_1 = arith.constant 0 : i32
    return %arg0, %c0_i32, %c0_i32_0 : i32, i32, i32
  }
  func.func @transform_3(%arg0: i32) -> (i32, i32) {
    %c0_i32 = arith.constant 0 : i32
    %c0_i32_0 = arith.constant 0 : i32
    %c0_i32_1 = arith.constant 0 : i32
    return %c0_i32, %c0_i32_0 : i32, i32
  }
  func.func @transform_4(%arg0: i32) -> (i32, i32) {
    %c0_i32 = arith.constant 0 : i32
    %c0_i32_0 = arith.constant 0 : i32
    %c0_i32_1 = arith.constant 0 : i32
    return %c0_i32, %c0_i32_0 : i32, i32
  }
  func.func @transform_5(%arg0: i32) -> (i32, i32) {
    %c0_i32 = arith.constant 0 : i32
    %c0_i32_0 = arith.constant 0 : i32
    %c0_i32_1 = arith.constant 0 : i32
    return %c0_i32, %c0_i32_0 : i32, i32
  }
  func.func @transform_6(%arg0: i32) -> (i32, i32) {
    %c0_i32 = arith.constant 0 : i32
    %c0_i32_0 = arith.constant 0 : i32
    %c0_i32_1 = arith.constant 0 : i32
    return %c0_i32, %c0_i32_0 : i32, i32
  }
  func.func @transform_7(%arg0: i32) -> (i32, i32, i32) {
    %c0_i32 = arith.constant 0 : i32
    %c0_i32_0 = arith.constant 0 : i32
    %c0_i32_1 = arith.constant 0 : i32
    return %arg0, %c0_i32, %c0_i32_0 : i32, i32, i32
  }
  func.func @transform_8(%arg0: i32) -> (i32, i32, i32) {
    %c0_i32 = arith.constant 0 : i32
    %c0_i32_0 = arith.constant 0 : i32
    %c0_i32_1 = arith.constant 0 : i32
    return %arg0, %c0_i32, %c0_i32_0 : i32, i32, i32
  }
  func.func @transform_9(%arg0: i32) -> (i32, i32, i32) {
    %c0_i32 = arith.constant 0 : i32
    %c0_i32_0 = arith.constant 0 : i32
    %c0_i32_1 = arith.constant 0 : i32
    return %arg0, %c0_i32, %c0_i32_0 : i32, i32, i32
  }
}

</mosaic_0001>

<bundles_post_ra>
// kernel: tpu_custom_call.1
= control target key start
LH: loop header
LB: loop body
LE: loop exit
PB: predicated region body
PF: predicated region fallthrough
CT: control target
= control target key end

     0   :  { %s2594_s0 = inlined_call_operand.vmem [shape: bf16[2,4,256], index: 0, kind: input, shape index: {}]   ;;  %s2595_s1 = inlined_call_operand.vmem [shape: f32[2,52,1], index: 1, kind: input, shape index: {}]   ;;  %s2596_s2 = inlined_call_operand.vmem [shape: bf16[2,1,256], index: 2, kind: input, shape index: {}]   ;;  %s2597_s3 = inlined_call_operand.vmem [shape: bf16[2,256], index: 3, kind: input, shape index: {}]   ;;  %s2598_s4 = inlined_call_operand.vmem [shape: bf16[8,36], index: 4, kind: input, shape index: {}]   ;;  %s2599_s5 = inlined_call_operand.vmem [shape: bf16[8,72], index: 5, kind: input, shape index: {}]   ;;  %s2600_s6 = inlined_call_operand.vmem [shape: bf16[3,8], index: 6, kind: input, shape index: {}]   ;;  %s2601_s7 = inlined_call_operand.vmem [shape: bf16[2,3,256], index: 7, kind: input, shape index: {}]   ;;  %s2602_s8 = inlined_call_operand.hbm [shape: bf16[2,8,256], index: 8, kind: output, shape index: {0}]   ;;  %s2603_s9 = inlined_call_operand.vmem [shape: bf16[2,3,256], index: 9, kind: output, shape index: {1}]  }
   0x1   :  { %2610 = sst [smem:[#allocation9_spill]] %s2594_s0 }
   0x2   :  { %15 = vsyncpa [#allocation7], 0 }
   0x3   :  { %17 = vsyncpa [#allocation7 + $0x1], 0  ;;  %s2251_s30 = smov 0   ;;  %s2253_s10 = smov 0  }
   0x4   :  { %s2255_s11 = smov 0   ;;  %s2257_s12 = smov 0  }
   0x5 LB: > { %s2272_s13 = sadd.s32 4294967295, %s2186_s12   ;;  %s1990_s14 = sadd.s32 4294967294, %s2186_s12   ;;  %s2186_s12 = sphi %s2257_s12, %s2620_s12   ;;  %s2182_s11 = sphi %s2255_s11, %s2619_s11   ;;  %s2178_s10 = sphi %s2253_s10, %s2618_s10   ;;  %s2174_s30 = sphi %s2251_s30, %s2617_s30  }
   0x6   : > { %s2276_s15 = sadd.s32 1, %s2186_s12   ;;  %s218_s16 = sadd.s32 1, %s2182_s11 }
   0x7   : > { %s215_s17 = ssub.s32 %s2186_s12, %s2276_s15  ;;  %p228_p0 = scmp.ne.s32.totalorder %s2182_s11, %s2178_s10 }
   0x8   : > { %p216_p1 = scmp.eq.s32.totalorder %s215_s17, 0  ;;  %p229_p2 = scmp.eq.s32.totalorder %s2272_s13, 1 }
   0x9   : > { %p234_p3 = scmp.ne.s32.totalorder %s2178_s10, %s2174_s30  ;;  %p235_p4 = scmp.eq.s32.totalorder %s1990_s14, 1 }
   0xa   : > { %s2287_s18 = scalar_select %p216_p1, %s2182_s11, %s218_s16  }
   0xb   : > { %p2289_p5 = por %p229_p2, %p228_p0  ;;  %p2293_p6 = por %p235_p4, %p234_p3 }
   0xc   : > { %p1993_p7 = scmp.ge.s32.totalorder %s2186_s12, 1  ;;  %p322_p8 = scmp.lt.s32.totalorder %s2186_s12, 3 }
   0xe   : > { %p323_p9 = pnand %p1993_p7, %p322_p8 }
   0xf   : > { %p377_p10 = scmp.lt.s32.totalorder (!%p323_p9), %s2272_s13, 1  ;;  %v420_v0 = vlaneseq (!%p323_p9)  ;;  %v2188_v1 = vmov (!%p323_p9), 0   ;;  %v2189_v2 = vmov (!%p323_p9), 1966171168   ;;  %v2190_v4 = vmov (!%p323_p9), 1983009808  }
  0x10   : > { %326 = sbr.rel (%p323_p9) target bundleno = 1172 (0x494), region = 52  ;;  %2112 = vset.pattern.permute.xlu0 (!%p323_p9), %v2188_v1  ;;  %426 = vst [vmem:[#allocation2] sm:$0x3] (!%p323_p9), %v2188_v1  ;;  %427 = vst [vmem:[#allocation2 + $0x6] sm:$0x3] (!%p323_p9), %v2188_v1  ;;  %v457_v3 = vunpack.c.l.s4 (!%p323_p9), %v2189_v2  ;;  %v488_v5 = vunpack.c.l.s4 (!%p323_p9), %v2190_v4  ;;  %2113 = vset.pattern.permute.xlu1 (!%p323_p9), %v2188_v1  ;;  %s2191_s28 = smov (!%p323_p9), 127  }
  0x11   : > { %1164 = vst [vmem:[#allocation4] sm:$0xf] (!%p323_p9), %v2188_v1  ;;  %1165 = vst [vmem:[#allocation4 + $0xc] sm:$0xf] (!%p323_p9), %v2188_v1  ;;  %v2314_v7 = vshrl.u32 (!%p323_p9), %v420_v0, 7  ;;  %1085 = vmatprep.mubr.bf16.mxu0 (!%p323_p9), %v2188_v1  ;;  %1698 = vmatprep.mubr.bf16.mxu1 (!%p323_p9), %v2188_v1  ;;  %s2604_s29 = smov (!%p323_p9), 111  }
  0x12   : > { %v2007_v6 = vld.sshfl [vmem:[%s2597_s3] sm:$0x11 pattern:$0x75316420] (!%p323_p9)  ;;  %v458_v8 = vunpack.c.0.s8 (!%p323_p9), %v457_v3  ;;  %v489_v10 = vunpack.c.0.s8 (!%p323_p9), %v488_v5  ;;  %s2606_s14 = smov (!%p323_p9), 113   ;;  %s2194_s16 = smov (!%p323_p9), 1  }
  0x13   : > { %v652_v9 = vcombine.high (!%p323_p9), %v2007_v6, %v2007_v6  ;;  %v2327_v13 = vsub.s32 (!%p323_p9), 0, %v2314_v7  ;;  %s2195_s17 = smov (!%p323_p9), 15   ;;  %s2196_s21 = smov (!%p323_p9), 17   ;;  %v2197_v31 = vmov (!%p323_p9), 839922192   ;;  %vm497_vm0 = vcmask (!%p323_p9), 908288  }
  0x14   : > { %v461_v11 = vsub.s32 (!%p323_p9), %v458_v8, %v2314_v7  ;;  %v2330_v16 = vsub.s32 (!%p323_p9), %v489_v10, %v2314_v7  ;;  %v418_v32 = vunpack.c.l.s4 (!%p323_p9), %v2197_v31  ;;  %s2613_s0 = sld [smem:[#allocation9_spill]] (!%p323_p9)  ;;  %vm694_vm1 = vcmask (!%p323_p9), 1039360   ;;  %s2608_s25 = smov (!%p323_p9), 112  }
  0x15   : > { %vm611_vm2 = vcmask (!%p323_p9), 924672   ;;  %vm721_vm3 = vcmask (!%p323_p9), 7168   ;;  %vm638_vm4 = vcmask (!%p323_p9), 121856   ;;  %vm525_vm5 = vcmask (!%p323_p9), 138240  }
  0x16   : > { %v659_v14 = vrot.slane (!%p323_p9), %v2007_v6, %v461_v11  ;;  %v666_v15 = vrot.slane (!%p323_p9), %v652_v9, %v461_v11  ;;  %v419_v33 = vunpack.c.0.s8 (!%p323_p9), %v418_v32  ;;  %vm523_vm6 = vcmask (!%p323_p9), 1043456  }
  0x17   : > { %s2312_s23 = scalar_select %p377_p10, %s2272_s13, 1  ;;  %vm553_vm7 = vcmask 130048   ;;  %vm924_vm8 = vcmask 916480   ;;  %vm1046_vm9 = vcmask 1041408   ;;  %vm1042_vm10 = vcmask 293888  }
  0x18   : > { %v668_v17 = vpack.i.b16 %v659_v14, %v659_v14  ;;  %v675_v18 = vpack.i.b16 %v666_v15, %v666_v15  ;;  %v583_v19 = vshrl.u32 %v659_v14, 16  ;;  %v591_v20 = vshrl.u32 %v666_v15, 16 }
  0x19   : > { %s2060_s24 = smul.u32 56, %s2312_s23  ;;  %s2351_s22 = sshll.u32 %s2312_s23, 2  ;;  %v422_v35 = vsub.s32 %v419_v33, %v2314_v7  ;;  %vm1656_vm13 = vcmask 588800  }
  0x1a   : > { %v673_v21 = vrot.slane %v668_v17, %v2327_v13  ;;  %v680_v22 = vrot.slane %v675_v18, %v2327_v13  ;;  %v584_v23 = vpack.i.b16 %v583_v19, %v583_v19  ;;  %v592_v24 = vpack.i.b16 %v591_v20, %v591_v20  ;;  %s381_s26 = scalar_lea.vmem %s2613_s0, %s2351_s22  ;;  %s2200_s0 = smov [#allocation6]  }
  0x1b   : > { %s2323_s27 = scalar_lea.vmem %s2595_s1, %s2060_s24  ;;  %v411_v34 = vld [vmem:[%s381_s26] sm:$0xf]  ;;  %s2198_s24 = smov 16  }
  0x1c   : > { %v402_v12 = vld [vmem:[%s2323_s27] sm:$0xff]  ;;  %v2334_v25 = vcombine.low %v673_v21, %v680_v22  ;;  %v589_v26 = vrot.slane %v584_v23, %v2327_v13  ;;  %v597_v27 = vrot.slane %v592_v24, %v2327_v13  ;;  %v412_v36 = vunpack.c.l.bf16 %v411_v34  ;;  %s2059_s26 = sshll.u32 %s2272_s13, 7 }
  0x1d   : > { %415 = vperm.xlu0 %2112, %v402_v12  }
  0x1e   : > { %v690_v28 = vrot.slane %v2334_v25, %v2330_v16  ;;  %v2340_v29 = vcombine.low %v589_v26, %v597_v27 }
  0x20   : > { %691 = vrot.lane.b32.xlu1 %v690_v28, %s2191_s28  ;;  %v607_v30 = vrot.slane %v2340_v29, %v2330_v16 }
  0x21   : > { %494 = vrot.lane.b32.xlu0 %v690_v28, %s2604_s29 }
  0x24   : > { %608 = vrot.lane.b32.xlu1 %v607_v30, %s2606_s14 }
  0x25   : > { %787 = vrot.lane.b32.xlu0 %v607_v30, %s2194_s16 }
  0x28   : > { %868 = vrot.lane.b32.xlu1 %v690_v28, %s2195_s17 }
  0x29   : > { %979 = vrot.lane.b32.xlu0 %v607_v30, %s2196_s21 }
  0x92   : > { %v692_v41 = vpop.permute.xlu1 %691 }
  0x93   : > { %v693_v46 = vrot.slane %v692_v41, 6 }
  0x95   : > { %v695_v57 = vsel %vm694_vm1, %v693_v46, %v692_v41 }
  0x96   : > { %v609_v45 = vpop.permute.xlu1 %608 }
  0x97   : > { %v610_v50 = vrot.slane %v609_v45, 6 }
  0x99   : > { %v612_v62 = vsel %vm611_vm2, %v610_v50, %v609_v45 }
  0x9a   : > { %v869_v51 = vpop.permute.xlu1 %868 }
  0x9b   : > { %v870_v63 = vrot.slane %v869_v51, 6 }
  0x9c   : > { %v2358_v37 = vpop.permute.xlu0 %415 }
  0x9d   : > { %v423_v38 = vrot.slane %v2358_v37, %v422_v35  ;;  %v871_v10 = vsel %vm638_vm4, %v870_v63, %v869_v51 }
  0x9f   : > { %v425_v39 = vmul.f32 %v423_v38, %v412_v36 }
  0xa0   : > { %v495_v43 = vpop.permute.xlu0 %494 }
  0xa1   : > { %v429_v40 = vcombine.high %v425_v39, %v425_v39  ;;  %v496_v44 = vrot.slane %v495_v43, 6 }
  0xa3   : > { %v2003_v42 = vpack.c.bf16 %v429_v40, %v425_v39  ;;  %v498_v48 = vsel %vm497_vm0, %v496_v44, %v495_v43  ;;  %v403_v43 = vld [vmem:[%s2323_s27 + $0x8] sm:$0xff]  ;;  %v405_v44 = vld [vmem:[%s2323_s27 + $0x18] sm:$0xff] }
  0xa4   : > { %v788_v53 = vpop.permute.xlu0 %787 }
  0xa5   : > { %2004 = vst.sshfl [vmem:[#allocation2 + $0x2] sm:$0x33 pattern:$0x76325410] %v2003_v42  ;;  %v789_v58 = vrot.slane %v788_v53, 6  ;;  %v404_v42 = vld [vmem:[%s2323_s27 + $0x10] sm:$0xff] }
  0xa7   : > { %v790_v6 = vsel %vm721_vm3, %v789_v58, %v788_v53 }
  0xa8   : > { %v980_v17 = vpop.permute.xlu0 %979 }
  0xa9   : > { %v981_v20 = vrot.slane %v980_v17, 6 }
  0xab   : > { %v982_v28 = vsel %vm525_vm5, %v981_v20, %v980_v17 }
  0xac   : > { %v445_v47 = vld [vmem:[#allocation2] sm:$0x3f] }
  0xad   : > { %v500_v49 = vmul.bf16 %v498_v48, %v445_v47  ;;  %v529_v52 = vld [vmem:[#allocation2] sm:$0x3f] }
  0xae   : > { %v545_v54 = vrot.slane %v529_v52, %v2330_v16  ;;  %v2008_v55 = vld.sshfl [vmem:[#allocation2 + $0x2] sm:$0x33 pattern:$0x76325410]  ;;  %v531_v0 = vcombine.low %v529_v52, %v529_v52 }
  0xaf   : > { %v642_v56 = vld [vmem:[#allocation2] sm:$0x3f]  ;;  %v509_v59 = vrot.slane %v500_v49, %v2330_v16  ;;  %735 = vst [vmem:[#allocation3 + $0x10] sm:$0x33] %v2008_v55  ;;  %v502_v18 = vcombine.high %v500_v49, %v500_v49 }
  0xb0   : > { %v900_v60 = vld [vmem:[#allocation2 + $0x2] sm:$0x3f]  ;;  %548 = vrot.lane.b32.xlu0 %v545_v54, %s2198_s24  ;;  %v697_v2 = vmul.bf16 %v695_v57, %v642_v56  ;;  %v538_v8 = vrot.slane %v531_v0, %v2330_v16 }
  0xb1   : > { %v557_v61 = vld [vmem:[#allocation2] sm:$0x3f]  ;;  %517 = vrot.lane.b32.xlu1 %v509_v59, %s2196_s21  ;;  %v916_v3 = vrot.slane %v900_v60, %v2330_v16  ;;  %v902_v22 = vcombine.low %v900_v60, %v900_v60  ;;  %v516_v24 = vrot.slane %v502_v18, %v2330_v16 }
  0xb2   : > { %v614_v4 = vmul.bf16 %v612_v62, %v557_v61  ;;  %v736_v5 = vld [vmem:[#allocation2 + $0x2] sm:$0x3f]  ;;  %v713_v12 = vrot.slane %v697_v2, %v2330_v16  ;;  %v699_v26 = vcombine.low %v697_v2, %v697_v2 }
  0xb3   : > { %v819_v9 = vld [vmem:[#allocation2 + $0x2] sm:$0x3f]  ;;  %v792_v11 = vmul.bf16 %v790_v6, %v736_v5  ;;  %v909_v30 = vrot.slane %v902_v22, %v2330_v16 }
  0xb4   : > { %919 = vrot.lane.b32.xlu0 %v916_v3, %s2608_s25  ;;  %v873_v14 = vmul.bf16 %v871_v10, %v819_v9  ;;  %v623_v15 = vrot.slane %v614_v4, %v2330_v16  ;;  %v616_v23 = vcombine.high %v614_v4, %v614_v4  ;;  %v928_v27 = vld [vmem:[#allocation2 + $0x2] sm:$0x3f]  ;;  %v706_v35 = vrot.slane %v699_v26, %v2330_v16 }
  0xb5   : > { %546 = vrot.lane.b32.xlu1 %v538_v8, %s2198_s24  ;;  %v808_v19 = vrot.slane %v792_v11, %v2330_v16  ;;  %v984_v32 = vmul.bf16 %v982_v28, %v928_v27  ;;  %v794_v34 = vcombine.low %v792_v11, %v792_v11 }
  0xb6   : > { %v882_v21 = vrot.slane %v873_v14, %v2330_v16  ;;  %v875_v31 = vcombine.high %v873_v14, %v873_v14  ;;  %v630_v33 = vrot.slane %v616_v23, %v2330_v16 }
  0xb7   : > { %v986_v36 = vcombine.high %v984_v32, %v984_v32  ;;  %v801_v39 = vrot.slane %v794_v34, %v2330_v16  ;;  %v993_v41 = vrot.slane %v984_v32, %v2330_v16 }
  0xb8   : > { %716 = vrot.lane.b32.xlu0 %v713_v12, %s2194_s16  ;;  %v889_v38 = vrot.slane %v875_v31, %v2330_v16 }
  0xb9   : > { %631 = vrot.lane.b32.xlu1 %v623_v15, %s2195_s17  ;;  %v1000_v40 = vrot.slane %v986_v36, %v2330_v16 }
  0xbc   : > { %811 = vrot.lane.b32.xlu0 %v808_v19, %s2191_s28 }
  0xbd   : > { %890 = vrot.lane.b32.xlu1 %v882_v21, %s2606_s14 }
  0xc0   : > { %519 = vrot.lane.b32.xlu0 %v516_v24, %s2196_s21 }
  0xc1   : > { %917 = vrot.lane.b32.xlu1 %v909_v30, %s2608_s25 }
  0xc4   : > { %633 = vrot.lane.b32.xlu0 %v630_v33, %s2195_s17 }
  0xc5   : > { %714 = vrot.lane.b32.xlu1 %v706_v35, %s2194_s16 }
  0xc8   : > { %892 = vrot.lane.b32.xlu0 %v889_v38, %s2606_s14 }
  0xc9   : > { %809 = vrot.lane.b32.xlu1 %v801_v39, %s2191_s28 }
  0xcc   : > { %1003 = vrot.lane.b32.xlu0 %v1000_v40, %s2604_s29 }
  0xcd   : > { %1001 = vrot.lane.b32.xlu1 %v993_v41, %s2604_s29 }
  0xd0   : > { %1108 = vperm.xlu0 %2112, %v404_v42   ;;  %v1011_v42 = vld [vmem:[%s2598_s4] sm:$0xf] }
  0xd1   : > { %1096 = vperm.xlu1 %2113, %v403_v43  }
  0xd4   : > { %1220 = vrot.lane.b32.xlu0 %v2334_v25, %s2604_s29  ;;  %s1998_s29 = sshll.u32 %s2312_s23, 1  ;;  %s2614_s23 = smov 112  }
  0xd5   : > { %1156 = vperm.xlu1 %2113, %v405_v44   ;;  %v1099_v44 = vrot.slane %v2358_v37, 4  ;;  %s390_s25 = scalar_lea.vmem %s2596_s2, %s1998_s29 }
  0xd6   : > { %v409_v37 = vld [vmem:[%s390_s25] sm:$0x3]  ;;  %s2128_s25 = sshll.u32 %s2200_s0, 4  ;;  %s2129_s25 = int_to_ptr.vmem [resolvable:$false] %s2128_s25 }
  0xd7   : > { %s2130_s29 = scalar_lea.vmem %s2129_s25, 256 }
  0xd8   : > { %1366 = vrot.lane.b32.xlu0 %v2334_v25, %s2191_s28 }
  0xd9   : > { %1301 = vrot.lane.b32.xlu1 %v2340_v29, %s2606_s14  ;;  %s2615_s14 = smov 113  }
  0xdc   : > { %1500 = vrot.lane.b32.xlu0 %v2334_v25, %s2195_s17 }
  0xdd   : > { %1435 = vrot.lane.b32.xlu1 %v2340_v29, %s2194_s16 }
  0xe1   : > { %1581 = vrot.lane.b32.xlu1 %v2340_v29, %s2196_s21 }
 0x122   : > { %v549_v45 = vpop.permute.xlu0 %548 }
 0x123   : > { %v518_v46 = vpop.permute.xlu1 %517  ;;  %v551_v49 = vrot.slane %v549_v45, 4 }
 0x124   : > { %v521_v57 = vrot.slane %v518_v46, 4 }
 0x126   : > { %v920_v47 = vpop.permute.xlu0 %919 }
 0x127   : > { %v547_v48 = vpop.permute.xlu1 %546  ;;  %v922_v59 = vrot.slane %v920_v47, 4 }
 0x128   : > { %v550_v50 = vrot.slane %v547_v48, 4 }
 0x12a   : > { %v552_v51 = vsel %vm523_vm6, %v550_v50, %v551_v49  ;;  %v717_v25 = vpop.permute.xlu0 %716 }
 0x12b   : > { %v554_v52 = vsel %vm553_vm7, %v547_v48, %v552_v51  ;;  %v632_v53 = vpop.permute.xlu1 %631  ;;  %v719_v6 = vrot.slane %v717_v25, 4  ;;  %v1389_v25 = vld [vmem:[#allocation4 + $0xc] sm:$0xf] }
 0x12c   : > { %556 = vst [vmem:[#allocation3] sm:$0xcc] %v554_v52  ;;  %v635_v2 = vrot.slane %v632_v53, 4 }
 0x12e   : > { %v812_v54 = vpop.permute.xlu0 %811 }
 0x12f   : > { %v891_v55 = vpop.permute.xlu1 %890  ;;  %v814_v19 = vrot.slane %v812_v54, 4 }
 0x130   : > { %v894_v14 = vrot.slane %v891_v55, 4 }
 0x132   : > { %v520_v56 = vpop.permute.xlu0 %519 }
 0x133   : > { %v522_v29 = vrot.slane %v520_v56, 4  ;;  %v918_v58 = vpop.permute.xlu1 %917 }
 0x134   : > { %v921_v60 = vrot.slane %v918_v58, 4 }
 0x135   : > { %v524_v61 = vsel %vm523_vm6, %v521_v57, %v522_v29 }
 0x136   : > { %v526_v62 = vsel %vm525_vm5, %v518_v46, %v524_v61  ;;  %v923_v63 = vsel %vm523_vm6, %v921_v60, %v922_v59  ;;  %v634_v0 = vpop.permute.xlu0 %633 }
 0x137   : > { %528 = vst [vmem:[#allocation3] sm:$0x33] %v526_v62  ;;  %v925_v3 = vsel %vm924_vm8, %v918_v58, %v923_v63  ;;  %v636_v4 = vrot.slane %v634_v0, 4  ;;  %v715_v5 = vpop.permute.xlu1 %714 }
 0x138   : > { %927 = vst [vmem:[#allocation3 + $0x18] sm:$0xcc] %v925_v3  ;;  %v718_v8 = vrot.slane %v715_v5, 4 }
 0x139   : > { %v637_v9 = vsel %vm523_vm6, %v635_v2, %v636_v4 }
 0x13a   : > { %v639_v10 = vsel %vm638_vm4, %v632_v53, %v637_v9  ;;  %v720_v11 = vsel %vm523_vm6, %v718_v8, %v719_v6  ;;  %v893_v12 = vpop.permute.xlu0 %892  ;;  %v1118_v53 = vsub.s32 2, %v2314_v7 }
 0x13b   : > { %641 = vst [vmem:[#allocation3 + $0x8] sm:$0x33] %v639_v10  ;;  %v722_v15 = vsel %vm721_vm3, %v715_v5, %v720_v11  ;;  %v895_v17 = vrot.slane %v893_v12, 4  ;;  %v810_v18 = vpop.permute.xlu1 %809 }
 0x13c   : > { %724 = vst [vmem:[#allocation3 + $0x8] sm:$0xcc] %v722_v15  ;;  %v813_v20 = vrot.slane %v810_v18, 4 }
 0x13d   : > { %v896_v21 = vsel %vm523_vm6, %v894_v14, %v895_v17 }
 0x13e   : > { %v897_v22 = vsel %vm611_vm2, %v891_v55, %v896_v21  ;;  %v815_v23 = vsel %vm523_vm6, %v813_v20, %v814_v19  ;;  %v1004_v24 = vpop.permute.xlu0 %1003 }
 0x13f   : > { %899 = vst [vmem:[#allocation3 + $0x18] sm:$0x33] %v897_v22  ;;  %v816_v26 = vsel %vm694_vm1, %v810_v18, %v815_v23  ;;  %v1002_v27 = vpop.permute.xlu1 %1001  ;;  %v1006_v28 = vrot.slane %v1004_v24, 4 }
 0x140   : > { %818 = vst [vmem:[#allocation3 + $0x10] sm:$0xcc] %v816_v26  ;;  %v1005_v30 = vrot.slane %v1002_v27, 4 }
 0x142   : > { %v1007_v31 = vsel %vm523_vm6, %v1005_v30, %v1006_v28 }
 0x143   : > { %v1008_v32 = vsel %vm497_vm0, %v1002_v27, %v1007_v31  ;;  %v2116_v33 = vld [vmem:[#allocation3 + $0x4] ss:$8 sps:$4 sm:$0xff]   ;;  %v2118_v34 = vld [vmem:[#allocation3] ss:$8 sps:$4 sm:$0xff]  }
 0x144   : > { %1010 = vst [vmem:[#allocation3 + $0x20] sm:$0x33] %v1008_v32  ;;  %1053 = vmatprep.subr.bf16.mxu0 %v2116_v33 }
 0x145   : > { %1054 = vmatpush1.bf16.msra.mxu0 %v2118_v34 }
 0x147   : > { %v2119_v35 = vld [vmem:[#allocation3 + $0x14] ss:$8 sps:$4 sm:$0xff]   ;;  %v2121_v36 = vld [vmem:[#allocation3 + $0x10] ss:$8 sps:$4 sm:$0xff]  }
 0x148   : > { %1055 = vmatprep.subr.bf16.mxu0 %v2119_v35 }
 0x149   : > { %1056 = vmatpush1.bf16.msra.mxu0 %v2121_v36 }
 0x14b   : > { %v1016_v38 = vld [vmem:[#allocation3 + $0x20] sm:$0x33] }
 0x14c   : > { %v2017_v39 = vcombine.high %v1016_v38, %v1016_v38  ;;  %v2016_v40 = vcombine.low %v1016_v38, %v1016_v38 }
 0x14e   : > { %2018 = vmatprep.subr.msk.bf16.mxu0 %vm1046_vm9, %v2017_v39  ;;  %v1048_v41 = vsel %vm1046_vm9, %v2016_v40, 0 }
 0x14f   : > { %1058 = vmatpush1.bf16.msra.mxu0 %v1048_v41  ;;  %v1109_v29 = vpop.permute.xlu0 %1108 }
 0x150   : > { %v1097_v43 = vpop.permute.xlu1 %1096  ;;  %v1158_v14 = vrot.slane %v1109_v29, 4 }
 0x151   : > { %v1100_v45 = vrot.slane %v1097_v43, 4 }
 0x152   : > { %2019 = vmatmul.mubr.msk.bf16.vlgmr.msra.gmra.mrb[0].mxu0 %vm1042_vm10, %v1011_v42 }
 0x153   : > { %v1101_v46 = vsel %vm523_vm6, %v1099_v44, %v1100_v45  ;;  %1815 = vmatprep.mubr.bf16.mxu0 %v2188_v1  ;;  %v410_v1 = vunpack.c.l.bf16 %v409_v37  ;;  %v1221_v24 = vpop.permute.xlu0 %1220  ;;  %v1535_v37 = vld [vmem:[#allocation4 + $0xc] sm:$0xf] }
 0x154   : > { %v2438_v47 = vpop.permute.xlu1 %1156  ;;  %v1222_v26 = vrot.slane %v1221_v24, 4 }
 0x155   : > { %v1115_v54 = vrot.slane %v410_v1, %v2327_v13  ;;  %v1119_v55 = vrot.slane %v410_v1, %v1118_v53  ;;  %v1159_v8 = vrot.slane %v2438_v47, 4  ;;  %v1521_v1 = vld [vmem:[#allocation4 + $0xc] sm:$0xf] }
 0x156   : > { %v1223_v28 = vsel %vm497_vm0, %v1222_v26, %v1221_v24 }
 0x157   : > { %v2453_v56 = vrot.slane %v1115_v54, %v2327_v13  ;;  %v2456_v57 = vrot.slane %v1119_v55, %v2327_v13  ;;  %v1160_v18 = vsel %vm523_vm6, %v1158_v14, %v1159_v8  ;;  %v1367_v34 = vpop.permute.xlu0 %1366 }
 0x158   : > { %v2440_v48 = vpop.permute.xlu1 %1301  ;;  %v1368_v36 = vrot.slane %v1367_v34, 4 }
 0x159   : > { %v1130_v58 = vmul.f32 %v2453_v56, %v1097_v43  ;;  %v1131_v59 = vmul.f32 %v2456_v57, %v1097_v43  ;;  %v1132_v60 = vmul.f32 %v2453_v56, %v1109_v29  ;;  %v1133_v61 = vmul.f32 %v2456_v57, %v1109_v29 }
 0x15a   : > { %v1303_v32 = vrot.slane %v2440_v48, 4  ;;  %v1369_v42 = vsel %vm694_vm1, %v1368_v36, %v1367_v34 }
 0x15b   : > { %v1138_v62 = vrot.slane %v1130_v58, 4  ;;  %v1141_v7 = vrot.slane %v1131_v59, 4  ;;  %v1139_v63 = vrot.slane %v1132_v60, 4  ;;  %v1142_v2 = vrot.slane %v1133_v61, 4  ;;  %v1501_v44 = vpop.permute.xlu0 %1500  ;;  %v407_v59 = vld [vmem:[%s2323_s27 + $0x28] sm:$0xff]  ;;  %v406_v60 = vld [vmem:[%s2323_s27 + $0x20] sm:$0xff] }
 0x15c   : > { %v1436_v49 = vpop.permute.xlu1 %1435  ;;  %v1304_v39 = vsel %vm611_vm2, %v1303_v32, %v2440_v48  ;;  %v408_v61 = vld [vmem:[%s2323_s27 + $0x30] sm:$0xf] }
 0x15d   : > { %v1437_v50 = vrot.slane %v1436_v49, 4  ;;  %v1140_v5 = vsel %vm523_vm6, %v1138_v62, %v1139_v63  ;;  %v1143_v10 = vsel %vm523_vm6, %v1141_v7, %v1142_v2 }
 0x15f   : > { %v2443_v51 = vsel %vm721_vm3, %v1437_v50, %v1436_v49  ;;  %v1442_v52 = vmul.bf16 %v1437_v50, %v1389_v25  ;;  %v1502_v50 = vrot.slane %v1501_v44, 4 }
 0x160   : > { %v1582_v48 = vpop.permute.xlu1 %1581 }
 0x161   : > { %1447 = vrot.lane.b32.xlu1 %v1442_v52, %s2191_s28  ;;  %v1583_v53 = vrot.slane %v1582_v48, 4  ;;  %v1503_v54 = vsel %vm638_vm4, %v1502_v50, %v1501_v44 }
 0x163   : > { %v1588_v55 = vmul.bf16 %v1583_v53, %v1535_v37  ;;  %v1584_v58 = vsel %vm525_vm5, %v1583_v53, %v1582_v48 }
 0x1d3   : > { %v1448_v62 = vpop.permute.xlu1 %1447 }
 0x225   : > { %v1087_v0 = vpop.f32.mrb[0].mxu0 }
 0x226   : > { %v1103_v3 = vmul.f32 %v1101_v46, %v1087_v0  ;;  %v1089_v4 = vpop.f32.mrb[1].mxu0 }
 0x227   : > { %v1104_v13 = vmul.f32 %v1101_v46, %v1089_v4  ;;  %v1091_v6 = vpop.f32.mrb[2].mxu0  ;;  %v1456_v46 = vld [vmem:[#allocation4 + $0xc] sm:$0xf] }
 0x228   : > { %v1146_v9 = vadd.f32 %v1140_v5, %v1103_v3  ;;  %v1092_v11 = vpop.f32.mrb[3].mxu0  ;;  %v1507_v25 = vmul.bf16 %v1502_v50, %v1456_v46 }
 0x229   : > { %v1147_v12 = vadd.f32 %v1143_v10, %v1104_v13 }
 0x22a   : > { %vm1148_vm11 = vcmp.ge.f32.partialorder %v1146_v9, 0.0  ;;  %v1150_v15 = vmul.f32 0.2, %v1146_v9 }
 0x22b   : > { %vm1149_vm12 = vcmp.ge.f32.partialorder %v1147_v12, 0.0  ;;  %v1151_v17 = vmul.f32 0.2, %v1147_v12 }
 0x22c   : > { %v1152_v19 = vsel %vm1148_vm11, %v1146_v9, %v1150_v15 }
 0x22d   : > { %v1162_v20 = vmul.f32 %v1160_v18, %v1152_v19  ;;  %v1153_v21 = vsel %vm1149_vm12, %v1147_v12, %v1151_v17 }
 0x22e   : > { %v1163_v22 = vmul.f32 %v1160_v18, %v1153_v21 }
 0x230   : > { %v2468_v23 = vpack.c.bf16 %v1163_v22, %v1162_v20 }
 0x232   : > { %1174 = vst [vmem:[#allocation4 + $0x4] sm:$0xff] %v2468_v23  ;;  %v1441_v52 = vmul.bf16 %v2468_v23, %v2443_v51  ;;  %v1506_v29 = vmul.bf16 %v2468_v23, %v1503_v54  ;;  %v1587_v51 = vmul.bf16 %v2468_v23, %v1584_v58 }
 0x239   : > { %v1254_v27 = vld [vmem:[#allocation4] sm:$0xff]  ;;  %v1176_v30 = vld [vmem:[#allocation4 + $0x8] sm:$0xf] }
 0x23a   : > { %v1241_v31 = vld [vmem:[#allocation4 + $0x8] sm:$0xf]  ;;  %1244 = vrot.lane.b32.xlu0 %v1254_v27, %s2198_s24  ;;  %v1226_v33 = vmul.bf16 %v1254_v27, %v1223_v28  ;;  %v1227_v35 = vmul.bf16 %v1222_v26, %v1176_v30  ;;  %v1307_v40 = vmul.bf16 %v1304_v39, %v1254_v27  ;;  %v1372_v45 = vmul.bf16 %v1369_v42, %v1254_v27 }
 0x23b   : > { %1246 = vrot.lane.b32.xlu1 %v1241_v31, %s2198_s24  ;;  %v1255_v38 = vld [vmem:[#allocation4 + $0x8] sm:$0xf] }
 0x23c   : > { %v1308_v41 = vmul.bf16 %v1303_v32, %v1255_v38  ;;  %v1322_v43 = vld [vmem:[#allocation4 + $0x8] sm:$0xf] }
 0x23d   : > { %v1373_v49 = vmul.bf16 %v1368_v36, %v1322_v43  ;;  %v1450_v36 = vrot.slane %v1448_v62, 4  ;;  %v1601_v62 = vld [vmem:[%s2599_s5] sm:$0xf] }
 0x23e   : > { %1230 = vrot.lane.b32.xlu0 %v1226_v33, %s2196_s21 }
 0x23f   : > { %1232 = vrot.lane.b32.xlu1 %v1227_v35, %s2196_s21 }
 0x242   : > { %1311 = vrot.lane.b32.xlu0 %v1307_v40, %s2195_s17 }
 0x243   : > { %1313 = vrot.lane.b32.xlu1 %v1308_v41, %s2195_s17  ;;  %s367_s17 = sand.u32 1, %s2178_s10  }
 0x244   : > { %s1994_s21 = sshll.u32 %s367_s17, 3 }
 0x245   : > { %s369_s24 = scalar_lea.vmem [#allocation6], %s1994_s21 }
 0x246   : > { %1376 = vrot.lane.b32.xlu0 %v1372_v45, %s2194_s16  ;;  %s1867_s27 = sshll.u32 %s369_s24, 4  ;;  %s1868_s27 = int_to_ptr.vmem [resolvable:$true] %s1867_s27 }
 0x247   : > { %1378 = vrot.lane.b32.xlu1 %v1373_v49, %s2194_s16  ;;  %s2616_s16 = smov 111   ;;  %s2124_s21 = scalar_lea.vmem %s1868_s27, 128 }
 0x248   : > { %p2125_p11 = scmp.ne.s32.totalorder %s1868_s27, %s2124_s21  ;;  %p2131_p0 = scmp.lt.s32.totalorder %s1868_s27, %s2129_s25 }
 0x249   : > { %p2132_p1 = scmp.lt.s32.totalorder %s2130_s29, %s2124_s21 }
 0x24a   : > { %1524 = vrot.lane.b32.xlu0 %v2468_v23, %s2614_s23  ;;  %p2126_p12 = pnand %p2125_p11, %p2289_p5 }
 0x24b   : > { %1512 = vrot.lane.b32.xlu1 %v1507_v25, %s2615_s14  ;;  %p2133_p2 = por %p2132_p1, %p2131_p0 }
 0x24c   : > { %p2127_p13 = pneg %p2126_p12 }
 0x24e   : > { %1445 = vrot.lane.b32.xlu0 %v1441_v52, %s2191_s28  ;;  %s1848_s28 = scalar_lea.sflag [#allocation7], %s367_s17  ;;  %p2134_p3 = pnand %p2133_p2, %p2127_p13 }
 0x24f   : > { %1526 = vrot.lane.b32.xlu1 %v1521_v1, %s2614_s23 }
 0x252   : > { %1510 = vrot.lane.b32.xlu0 %v1506_v29, %s2615_s14 }
 0x253   : > { %1593 = vrot.lane.b32.xlu1 %v1588_v55, %s2616_s16 }
 0x256   : > { %1591 = vrot.lane.b32.xlu0 %v1587_v51, %s2616_s16  ;;  %s2546_s16 = scalar_lea.hbm %s2602_s8, %s2059_s26 }
 0x257   : > { %1719 = vperm.xlu1 %2113, %v407_v59  }
 0x25a   : > { %1709 = vperm.xlu0 %2112, %v406_v60  }
 0x25e   : > { %1758 = vperm.xlu0 %2112, %v408_v61  }
 0x2ac   : > { %v1245_v7 = vpop.permute.xlu0 %1244 }
 0x2ad   : > { %v1247_v63 = vpop.permute.xlu1 %1246  ;;  %v1248_v2 = vrot.slane %v1245_v7, 4 }
 0x2ae   : > { %v1249_v0 = vrot.slane %v1247_v63, 4 }
 0x2b0   : > { %v1231_v3 = vpop.permute.xlu0 %1230  ;;  %v1250_v6 = vsel %vm523_vm6, %v1248_v2, %v1249_v0 }
 0x2b1   : > { %v1233_v4 = vpop.permute.xlu1 %1232  ;;  %v1234_v5 = vrot.slane %v1231_v3, 4  ;;  %v1251_v14 = vsel %vm553_vm7, %v1245_v7, %v1250_v6 }
 0x2b2   : > { %v1235_v13 = vrot.slane %v1233_v4, 4 }
 0x2b4   : > { %v1312_v9 = vpop.permute.xlu0 %1311  ;;  %v1236_v10 = vsel %vm523_vm6, %v1234_v5, %v1235_v13 }
 0x2b5   : > { %v1314_v11 = vpop.permute.xlu1 %1313  ;;  %v1237_v12 = vsel %vm525_vm5, %v1231_v3, %v1236_v10  ;;  %v1315_v17 = vrot.slane %v1312_v9, 4 }
 0x2b6   : > { %v1316_v15 = vrot.slane %v1314_v11, 4  ;;  %v2034_v18 = vcombine.high %v1237_v12, %v1251_v14  ;;  %v2033_v19 = vcombine.low %v1237_v12, %v1251_v14 }
 0x2b8   : > { %1666 = vmatprep.subr.bf16.mxu1 %v2034_v18  ;;  %v1377_v20 = vpop.permute.xlu0 %1376  ;;  %v1317_v24 = vsel %vm523_vm6, %v1315_v17, %v1316_v15 }
 0x2b9   : > { %v1379_v21 = vpop.permute.xlu1 %1378  ;;  %1667 = vmatpush1.bf16.msra.mxu1 %v2033_v19  ;;  %v1380_v22 = vrot.slane %v1377_v20, 4  ;;  %v1318_v30 = vsel %vm638_vm4, %v1312_v9, %v1317_v24 }
 0x2ba   : > { %v1381_v26 = vrot.slane %v1379_v21, 4 }
 0x2bc   : > { %v1382_v27 = vsel %vm523_vm6, %v1380_v22, %v1381_v26  ;;  %v1525_v28 = vpop.permute.xlu0 %1524 }
 0x2bd   : > { %v1383_v31 = vsel %vm721_vm3, %v1377_v20, %v1382_v27  ;;  %v1513_v32 = vpop.permute.xlu1 %1512  ;;  %v1528_v41 = vrot.slane %v1525_v28, 4 }
 0x2be   : > { %v2035_v33 = vcombine.low %v1318_v30, %v1383_v31  ;;  %v2036_v34 = vcombine.high %v1318_v30, %v1383_v31  ;;  %v1515_v43 = vrot.slane %v1513_v32, 4 }
 0x2c0   : > { %1668 = vmatprep.subr.bf16.mxu1 %v2036_v34  ;;  %v1446_v35 = vpop.permute.xlu0 %1445 }
 0x2c1   : > { %v1527_v38 = vpop.permute.xlu1 %1526  ;;  %1669 = vmatpush1.bf16.msra.mxu1 %v2035_v33  ;;  %v1449_v39 = vrot.slane %v1446_v35, 4 }
 0x2c2   : > { %v1529_v40 = vrot.slane %v1527_v38, 4  ;;  %v1755_v38 = vld [vmem:[%s2600_s6] sm:$0x3] }
 0x2c3   : > { %v1451_v42 = vsel %vm523_vm6, %v1449_v39, %v1450_v36 }
 0x2c4   : > { %v1452_v44 = vsel %vm694_vm1, %v1446_v35, %v1451_v42  ;;  %v1511_v45 = vpop.permute.xlu0 %1510  ;;  %v1530_v46 = vsel %vm523_vm6, %v1528_v41, %v1529_v40 }
 0x2c5   : > { %v2037_v49 = vcombine.low %v2468_v23, %v1452_v44  ;;  %v2038_v50 = vcombine.high %v2468_v23, %v1452_v44  ;;  %v1514_v25 = vrot.slane %v1511_v45, 4  ;;  %v1594_v48 = vpop.permute.xlu1 %1593  ;;  %v1531_v1 = vsel %vm924_vm8, %v1525_v28, %v1530_v46 }
 0x2c6   : > { %v1596_v37 = vrot.slane %v1594_v48, 4 }
 0x2c7   : > { %v1516_v52 = vsel %vm523_vm6, %v1514_v25, %v1515_v43  ;;  %1670 = vmatprep.subr.bf16.mxu1 %v2038_v50 }
 0x2c8   : > { %v1517_v53 = vsel %vm611_vm2, %v1511_v45, %v1516_v52  ;;  %1671 = vmatpush1.bf16.msra.mxu1 %v2037_v49  ;;  %v1592_v54 = vpop.permute.xlu0 %1591 }
 0x2c9   : > { %v2039_v55 = vcombine.low %v1517_v53, %v1531_v1  ;;  %v2040_v29 = vcombine.high %v1517_v53, %v1531_v1  ;;  %v1595_v58 = vrot.slane %v1592_v54, 4 }
 0x2cb   : > { %v1597_v51 = vsel %vm523_vm6, %v1595_v58, %v1596_v37  ;;  %1672 = vmatprep.subr.bf16.mxu1 %v2040_v29 }
 0x2cc   : > { %v1598_v23 = vsel %vm497_vm0, %v1592_v54, %v1597_v51  ;;  %1673 = vmatpush1.bf16.msra.mxu1 %v2039_v55  ;;  %vm1773_vm0 = vcmask 64512  }
 0x2cd   : > { %v2041_v59 = vcombine.low %v1598_v23, %v1598_v23  ;;  %v2042_v60 = vcombine.high %v1598_v23, %v1598_v23 }
 0x2cf   : > { %2043 = vmatprep.subr.msk.bf16.mxu1 %vm523_vm6, %v2042_v60  ;;  %v1661_v61 = vsel %vm523_vm6, %v2041_v59, 0 }
 0x2d0   : > { %1675 = vmatpush1.bf16.msra.mxu1 %v1661_v61 }
 0x2d3   : > { %2044 = vmatmul.mubr.msk.bf16.vlgmr.msra.gmra.mrb[0].mxu1 %vm1656_vm13, %v1601_v62 }
 0x2d6   : > { %v1720_v63 = vpop.permute.xlu1 %1719 }
 0x2d7   : > { %v1724_v3 = vmul.f32 %v1720_v63, %v2453_v56  ;;  %v1725_v5 = vmul.f32 %v1720_v63, %v2456_v57  ;;  %v1760_v26 = vrot.slane %v1720_v63, 4 }
 0x2d9   : > { %v1710_v7 = vpop.permute.xlu0 %1709  ;;  %v1731_v9 = vrot.slane %v1724_v3, 4  ;;  %v1734_v14 = vrot.slane %v1725_v5, 4 }
 0x2da   : > { %v1722_v0 = vmul.f32 %v1710_v7, %v2453_v56  ;;  %v1723_v2 = vmul.f32 %v1710_v7, %v2456_v57  ;;  %v1711_v4 = vrot.slane %v1710_v7, 4 }
 0x2dc   : > { %v1730_v13 = vrot.slane %v1722_v0, 4  ;;  %v1733_v6 = vrot.slane %v1723_v2, 4  ;;  %v1712_v12 = vsel %vm523_vm6, %v1159_v8, %v1711_v4 }
 0x2dd   : > { %v1759_v10 = vpop.permute.xlu0 %1758 }
 0x2de   : > { %v1732_v18 = vsel %vm523_vm6, %v1730_v13, %v1731_v9  ;;  %v1761_v20 = vrot.slane %v1759_v10, 4  ;;  %v1735_v21 = vsel %vm523_vm6, %v1733_v6, %v1734_v14 }
 0x2e0   : > { %v1762_v27 = vsel %vm523_vm6, %v1760_v26, %v1761_v20 }
 0x3a6   : > { %v1700_v11 = vpop.f32.mrb[0].mxu1 }
 0x3a7   : > { %v1714_v15 = vmul.f32 %v1712_v12, %v1700_v11  ;;  %v1702_v17 = vpop.f32.mrb[1].mxu1 }
 0x3a8   : > { %v1715_v19 = vmul.f32 %v1712_v12, %v1702_v17  ;;  %v1704_v56 = vpop.f32.mrb[2].mxu1 }
 0x3a9   : > { %v1738_v57 = vadd.f32 %v1732_v18, %v1714_v15  ;;  %v1705_v22 = vpop.f32.mrb[3].mxu1 }
 0x3aa   : > { %v1739_v24 = vadd.f32 %v1735_v21, %v1715_v19 }
 0x3ab   : > { %vm1740_vm14 = vcmp.ge.f32.partialorder %v1738_v57, 0.0  ;;  %v1742_v47 = vmul.f32 0.2, %v1738_v57 }
 0x3ac   : > { %vm1741_vm15 = vcmp.ge.f32.partialorder %v1739_v24, 0.0  ;;  %v1743_v8 = vmul.f32 0.2, %v1739_v24 }
 0x3ad   : > { %v1744_v28 = vsel %vm1740_vm14, %v1738_v57, %v1742_v47 }
 0x3ae   : > { %v1745_v30 = vsel %vm1741_vm15, %v1739_v24, %v1743_v8  ;;  %v1764_v31 = vmul.f32 %v1762_v27, %v1744_v28 }
 0x3af   : > { %v1765_v32 = vmul.f32 %v1762_v27, %v1745_v30  ;;  %v2058_v33 = vpack.c.bf16 %v1745_v30, %v1744_v28 }
 0x3b0   : > { %v1766_v34 = vpack.c.bf16 %v1764_v31, %v1764_v31 }
 0x3b1   : > { %v1767_v35 = vpack.c.bf16 %v1765_v32, %v1765_v32  ;;  %1754 = vst [vmem:[%s369_s24] sm:$0xff] %v2058_v33 }
 0x3b2   : > { %v1778_v36 = vsel %vm523_vm6, %v1766_v34, 0 }
 0x3b3   : > { %2046 = vmatprep.subr.msk.bf16.mxu0 %vm523_vm6, %v1767_v35 }
 0x3b4   : > { %1784 = vmatpush1.bf16.msra.mxu0 %v1778_v36 }
 0x3b7   : > { %2047 = vmatmul.mubr.msk.bf16.vlgmr.msra.gmra.mrb[4].mxu0 %vm1773_vm0, %v1755_v38 }
 0x3b8   : > { %2137 = shalt.err (!%p2134_p3)
}
 0x3b9   : > { %s2138_s13 = scalar_lea.hbm %s2546_s16, 128  ;;  %s2142_s0 = scalar_lea.hbm %s2602_s8, 256 }
 0x3ba   : > { %p2139_p4 = scmp.ne.s32.totalorder %s2546_s16, %s2138_s13  ;;  %p2143_p9 = scmp.lt.u32.totalorder %s2546_s16, %s2602_s8 }
 0x3bb   : > { %p2144_p10 = scmp.lt.u32.totalorder %s2142_s0, %s2138_s13  ;;  %p2146_p12 = scmp.lt.u32.totalorder %s2138_s13, %s2546_s16 }
 0x3bc   : > { %p2140_p7 = pnand %p2139_p4, %p2289_p5 }
 0x3bd   : > { %p2145_p11 = por %p2144_p10, %p2143_p9 }
 0x3be   : > { %p2141_p8 = pneg %p2140_p7 }
 0x3bf   : > { %p2147_p13 = por %p2146_p12, %p2145_p11 }
 0x3c1   : > { %p2148_p0 = pnand %p2147_p13, %p2141_p8 }
 0x3c3   : > { %2151 = shalt.err (!%p2148_p0)
}
 0x3c4   : > { %2061 = dma.vmem_to_hbm [thread:$0]  (%p2289_p5), %s1868_s27, 128, %s2546_s16, %s1848_s28   ;;  %vm1838_vm1 = vsmask.f32 1280  ;;  %vm1840_vm2 = vcmask 1043458   ;;  %vm1841_vm3 = vsmask.f32 3328 }
 0x3c5   : > { %s395_s25 = scalar_lea.vmem %s2601_s7, %s2351_s22  ;;  %vm1839_vm4 = vmand %vm1046_vm9, %vm1838_vm1  ;;  %s400_s13 = scalar_lea.vmem %s2603_s9, %s2351_s22 }
 0x3c6   : > { %v1768_v39 = vld [vmem:[%s395_s25] sm:$0xf]  ;;  %vm1842_vm5 = vmand %vm1840_vm2, %vm1841_vm3 }
 0x3c7   : > { %v1769_v40 = vunpack.c.l.bf16 %v1768_v39  ;;  %vm1843_vm6 = vmor %vm1842_vm5, %vm1839_vm4  ;;  %v1844_v25 = vld [vmem:[%s400_s13] sm:$0xf] }
 0x3c9   : > { %v1771_v41 = vcombine.high %v1769_v40, %v1769_v40 }
 0x48a   : > { %v1817_v42 = vpop.f32.mrb[4].mxu0 }
 0x48b   : > { %v1818_v43 = vadd.f32 %v1817_v42, %v1769_v40  ;;  %v1819_v44 = vpop.f32.mrb[5].mxu0 }
 0x48c   : > { %v1820_v45 = vadd.f32 %v1819_v44, %v1771_v41  ;;  %v1821_v46 = vpop.f32.mrb[6].mxu0 }
 0x48d   : > { %v1822_v49 = vpop.f32.mrb[7].mxu0 }
 0x48e   : > { %v2048_v50 = vpack.c.bf16 %v1820_v45, %v1818_v43 }
 0x490   : > { %v1835_v48 = vrot.slane %v2048_v50, %v2330_v16 }
 0x492   : > { %v1845_v52 = vsel %vm1843_vm6, %v1835_v48, %v1844_v25 }
 0x493   : > { %1846 = vst [vmem:[%s400_s13] sm:$0xf] %v1845_v52 }
 0x494 PF: > { %p2067_p5 = scmp.ge.s32.totalorder %s2186_s12, 2  ;;  %s1882_s16 = sand.u32 1, %s2174_s30  }
 0x495   : > { %s1883_s22 = scalar_lea.sflag [#allocation7], %s1882_s16 }
 0x496   : > { %p2064_p1 = pnand %p2067_p5, %p2293_p6 }
 0x498   : > { %2169 = dma.done.wait (!%p2064_p1), %s1883_s22, 128  }
 0x499   : > { %2171 = vsyncadd (!%p2064_p1), %s1883_s22, 4294967168  ;;  %p20_p2 = scmp.ge.s32.totalorder %s2276_s15, 4   ;;  %s2617_s30 = smov %s2178_s10 }
 0x49a   : > { %s2618_s10 = smov %s2182_s11  ;;  %s2619_s11 = smov %s2287_s18 }
 0x49b   : > { %s2620_s12 = smov %s2276_s15  ;;  %22 = sbr.rel (!%p20_p2) target bundleno = 5 (0x5), region = 108 }
 0x4a2   :  { %1896 = vsyncpa [#allocation7], 1 }
 0x4a3   :  { %1898 = vsyncpa [#allocation7 + $0x1], 1 }

</bundles_post_ra>
